<compile_context>
chip_gen: v5e
topology: v5e:2x2
jax: 0.10.0
libtpu: 0.0.40
codegen_flags: <defaults>
</compile_context>

<pallas_src>
import functools

import jax
import jax.numpy as jnp
import numpy as np
from jax import lax
from jax.experimental import pallas as pl
from jax.experimental.pallas import tpu as pltpu


def _round_up(n, m):
    return ((n + m - 1) // m) * m


def _tensorcores_per_chip():
    """v7x has 2 TensorCores per chip; v5e/v6e have 1.  A batch split across a
    'parallel' grid axis only pays off with >=2 TCs (on a 1-TC chip it just
    serializes the latency-bound recurrence), so gate on device kind and
    default to 1."""
    try:
        kind = jax.devices()[0].device_kind.lower()
        if "v7" in kind or "7x" in kind:
            return 2
    except Exception:
        pass
    return 1


# ----------------------------------------------------------------------------
# Single fused kernel: num_layers Elman RNN layers + final Linear.
# Ref order (positional): x2d,
#                         [wih_t, whh_t, bias] * num_layers,
#                         wfc_t, bfc,
#                         out,
#                         act_scratch, proj_scratch
# ----------------------------------------------------------------------------
def fused_forward_kernel(x_ref, *refs, seq_len, batch, num_layers):
    layer_refs = refs[:3 * num_layers]
    wfc_ref, bfc_ref = refs[3 * num_layers:3 * num_layers + 2]
    out_ref = refs[3 * num_layers + 2]
    act_ref, proj_ref = refs[3 * num_layers + 3:]

    hdim = act_ref.shape[1]          # padded hidden size (multiple of 128)
    # Partial unroll: LLO visibility without unbounded code size / vreg use.
    unroll = max(1, min(seq_len, 8))

    for layer in range(num_layers):
        wih_ref, whh_ref, b_ref = layer_refs[3 * layer:3 * layer + 3]

        # Hoisted input projection over the whole sequence: one large
        # MXU-friendly bf16 matmul with f32 accumulation.  Bias folded once.
        inp = x_ref[...] if layer == 0 else act_ref[...]
        proj_ref[...] = (
            jnp.dot(inp.astype(jnp.bfloat16), wih_ref[...],
                    preferred_element_type=jnp.float32)
            + b_ref[...]
        )

        def step(t, h, _whh_ref=whh_ref):
            r = pl.multiple_of(t * batch, batch)     # 8-aligned sublane offset
            # RHS streams from VMEM (no vreg hoist of W_hh -> no spill storm at
            # H_pad>=256); bf16 operands, f32 accumulate, tanh/bias in f32.
            h_new = jnp.tanh(
                proj_ref[pl.ds(r, batch), :]
                + jnp.dot(h.astype(jnp.bfloat16), _whh_ref[...],
                          preferred_element_type=jnp.float32)
            )
            act_ref[pl.ds(r, batch), :] = h_new
            return h_new

        lax.fori_loop(0, seq_len, step,
                      jnp.zeros((batch, hdim), jnp.float32), unroll=unroll)

    # Final Linear over the whole (S*B, H) slab: one matmul, lane-dense store.
    out_ref[...] = (
        jnp.dot(act_ref[...].astype(jnp.bfloat16), wfc_ref[...],
                preferred_element_type=jnp.float32)
        + bfc_ref[...]
    ).astype(out_ref.dtype)


# ----------------------------------------------------------------------------
# Wrapper: pad to TPU-friendly shapes, build the single pallas_call, un-pad.
# ----------------------------------------------------------------------------
def rnn_module_forward(x, params):
    """x: (S, B, input_dims) -> (S, B, num_classes).  Eval-mode forward."""
    S, B, I = x.shape
    layers = params["rnn_layers"]
    L = len(layers)
    H = layers[0][0].shape[0]
    C = params["fc_w"].shape[0]

    ns = _tensorcores_per_chip()       # batch splits (2 on v7x, else 1)
    B_pad = _round_up(B, 8 * ns)       # sublane alignment per core
    Bh = B_pad // ns                   # batch rows handled by each core
    H_pad = _round_up(H, 128)          # lane alignment (matmul output dims)
    C_pad = _round_up(C, 128)

    # Zero-pad batch only (input feature dim I stays un-padded: it is only a
    # contraction dim).  Lay out as (ns, S*Bh, I) so each grid step / core gets
    # a contiguous, sublane-aligned slab of its own batch rows.
    x_p = jnp.zeros((S, B_pad, I), jnp.float32).at[:, :B, :].set(
        x.astype(jnp.float32))
    x3 = x_p.reshape(S, ns, Bh, I).transpose(1, 0, 2, 3).reshape(ns, S * Bh, I)

    def full_spec():
        # Full-array 2D block, identical for every grid step (resident weights).
        return pl.BlockSpec(None, lambda c: (0, 0))

    inputs = [x3]
    in_specs = [pl.BlockSpec((None, S * Bh, I), lambda c: (c, 0, 0))]

    for li, (w_ih, w_hh, b_ih, b_hh) in enumerate(layers):
        in_d = I if li == 0 else H
        in_pad = I if li == 0 else H_pad
        wih_t = jnp.zeros((in_pad, H_pad), jnp.float32).at[:in_d, :H].set(
            jnp.asarray(w_ih, jnp.float32).T).astype(jnp.bfloat16)
        whh_t = jnp.zeros((H_pad, H_pad), jnp.float32).at[:H, :H].set(
            jnp.asarray(w_hh, jnp.float32).T).astype(jnp.bfloat16)
        bias = jnp.zeros((1, H_pad), jnp.float32).at[0, :H].set(
            jnp.asarray(b_ih + b_hh, jnp.float32))
        inputs += [wih_t, whh_t, bias]
        in_specs += [pl.BlockSpec((in_pad, H_pad), lambda c: (0, 0)),
                     pl.BlockSpec((H_pad, H_pad), lambda c: (0, 0)),
                     pl.BlockSpec((1, H_pad), lambda c: (0, 0))]

    wfc_t = jnp.zeros((H_pad, C_pad), jnp.float32).at[:H, :C].set(
        jnp.asarray(params["fc_w"], jnp.float32).T).astype(jnp.bfloat16)
    bfc = jnp.zeros((1, C_pad), jnp.float32).at[0, :C].set(
        jnp.asarray(params["fc_b"], jnp.float32))
    inputs += [wfc_t, bfc]
    in_specs += [pl.BlockSpec((H_pad, C_pad), lambda c: (0, 0)),
                 pl.BlockSpec((1, C_pad), lambda c: (0, 0))]

    out_spec = pl.BlockSpec((None, S * Bh, C_pad), lambda c: (c, 0, 0))

    # Explicit VMEM budget: the scoped default is only 16 MiB on v5e (32 MiB
    # on v6e/v7x); size it from the actual buffers with 2x headroom.
    bytes_in = sum(int(a.size) * a.dtype.itemsize for a in inputs)
    bytes_out = ns * S * Bh * C_pad * 4
    bytes_scratch = 2 * S * Bh * H_pad * 4
    vmem_limit = int(min(100 * 2**20,
                         max(32 * 2**20,
                             2 * (bytes_in + bytes_out + bytes_scratch))))

    out3 = pl.pallas_call(
        functools.partial(fused_forward_kernel,
                          seq_len=S, batch=Bh, num_layers=L),
        out_shape=jax.ShapeDtypeStruct((ns, S * Bh, C_pad), jnp.float32),
        grid=(ns,),
        in_specs=in_specs,
        out_specs=out_spec,
        scratch_shapes=[
            pltpu.VMEM((S * Bh, H_pad), jnp.float32),  # act: layer output slab
            pltpu.VMEM((S * Bh, H_pad), jnp.float32),  # proj: hoisted x@Wih
        ],
        compiler_params=pltpu.CompilerParams(
            dimension_semantics=("parallel",),
            vmem_limit_bytes=vmem_limit),
    )(*inputs)

    out = out3.reshape(ns, S, Bh, C_pad).transpose(1, 0, 2, 3)
    return out.reshape(S, B_pad, C_pad)[:, :B, :C]


# ----------------------------------------------------------------------------
# Pure-JAX reference (correctness check only; full f32).
# ----------------------------------------------------------------------------
def reference_forward(x, params):
    h = x
    for (w_ih, w_hh, b_ih, b_hh) in params["rnn_layers"]:
        S, B, _ = h.shape
        H = w_ih.shape[0]

        def step(h_prev, x_t):
            h_new = jnp.tanh(x_t @ w_ih.T + b_ih + h_prev @ w_hh.T + b_hh)
            return h_new, h_new

        _, outs = jax.lax.scan(step, jnp.zeros((B, H), jnp.float32), h)
        h = outs
    return h @ params["fc_w"].T + params["fc_b"]


# ----------------------------------------------------------------------------
# Parameter construction (deterministic, synthetic).
# ----------------------------------------------------------------------------
def init_params(key, input_dims, hidden_dims, num_layers, num_classes):
    params = {"rnn_layers": []}
    for layer in range(num_layers):
        in_d = input_dims if layer == 0 else hidden_dims
        key, k1, k2, k3, k4 = jax.random.split(key, 5)
        scale = 1.0 / np.sqrt(hidden_dims)
        params["rnn_layers"].append((
            jax.random.uniform(k1, (hidden_dims, in_d), jnp.float32, -scale, scale),
            jax.random.uniform(k2, (hidden_dims, hidden_dims), jnp.float32, -scale, scale),
            jax.random.uniform(k3, (hidden_dims,), jnp.float32, -scale, scale),
            jax.random.uniform(k4, (hidden_dims,), jnp.float32, -scale, scale),
        ))
    key, k5, k6 = jax.random.split(key, 3)
    scale = 1.0 / np.sqrt(hidden_dims)
    params["fc_w"] = jax.random.uniform(k5, (num_classes, hidden_dims), jnp.float32, -scale, scale)
    params["fc_b"] = jax.random.uniform(k6, (num_classes,), jnp.float32, -scale, scale)
    return params


if __name__ == "__main__":
    SEQ, BATCH = 8, 4
    INPUT_DIMS, HIDDEN_DIMS, NUM_LAYERS, NUM_CLASSES = 16, 32, 2, 10

    key = jax.random.PRNGKey(0)
    key, xk = jax.random.split(key)
    # layout: (seq_len, batch, input_dims), PyTorch nn.RNN default (batch_first=False)
    x = jax.random.normal(xk, (SEQ, BATCH, INPUT_DIMS), jnp.float32)
    params = init_params(key, INPUT_DIMS, HIDDEN_DIMS, NUM_LAYERS, NUM_CLASSES)

    out = rnn_module_forward(x, params)
    out = jax.block_until_ready(out)

    ref = jax.block_until_ready(reference_forward(x, params))
    # bf16 MXU operands (f32 accumulation) across a tanh recurrence: loosened
    # tolerance per review; structural errors would be O(1), not O(1e-2).
    np.testing.assert_allclose(np.asarray(out), np.asarray(ref),
                               atol=5e-2, rtol=5e-2)
    assert out.shape == (SEQ, BATCH, NUM_CLASSES)

    print("KERNEL_OK")
</pallas_src>

<mosaic_0001>
module attributes {stable_mosaic.version = 11 : i64} {
  func.func @fused_forward_kernel(%arg0: i32, %arg1: memref<1x64x16xf32, #tpu.memory_space<vmem>>, %arg2: memref<16x128xbf16, #tpu.memory_space<vmem>>, %arg3: memref<128x128xbf16, #tpu.memory_space<vmem>>, %arg4: memref<1x128xf32, #tpu.memory_space<vmem>>, %arg5: memref<128x128xbf16, #tpu.memory_space<vmem>>, %arg6: memref<128x128xbf16, #tpu.memory_space<vmem>>, %arg7: memref<1x128xf32, #tpu.memory_space<vmem>>, %arg8: memref<128x128xbf16, #tpu.memory_space<vmem>>, %arg9: memref<1x128xf32, #tpu.memory_space<vmem>>, %arg10: memref<1x64x128xf32, #tpu.memory_space<vmem>>, %arg11: memref<64x128xf32, #tpu.memory_space<vmem>>, %arg12: memref<64x128xf32, #tpu.memory_space<vmem>>) attributes {dimension_semantics = [#tpu.dimension_semantics<parallel>], iteration_bounds = array<i64: 1>, scalar_prefetch = 0 : i64, scratch_operands = 2 : i64, tpu.core_type = #tpu.core_type<tc>, window_params = [{transform_indices = @transform_0, window_bounds = array<i64: 1, 64, 16>}, {pipeline_mode = #tpu.pipeline_mode<synchronous>, transform_indices = @transform_1, window_bounds = array<i64: 16, 128>}, {pipeline_mode = #tpu.pipeline_mode<synchronous>, transform_indices = @transform_2, window_bounds = array<i64: 128, 128>}, {pipeline_mode = #tpu.pipeline_mode<synchronous>, transform_indices = @transform_3, window_bounds = array<i64: 1, 128>}, {pipeline_mode = #tpu.pipeline_mode<synchronous>, transform_indices = @transform_4, window_bounds = array<i64: 128, 128>}, {pipeline_mode = #tpu.pipeline_mode<synchronous>, transform_indices = @transform_5, window_bounds = array<i64: 128, 128>}, {pipeline_mode = #tpu.pipeline_mode<synchronous>, transform_indices = @transform_6, window_bounds = array<i64: 1, 128>}, {pipeline_mode = #tpu.pipeline_mode<synchronous>, transform_indices = @transform_7, window_bounds = array<i64: 128, 128>}, {pipeline_mode = #tpu.pipeline_mode<synchronous>, transform_indices = @transform_8, window_bounds = array<i64: 1, 128>}, {transform_indices = @transform_9, window_bounds = array<i64: 1, 64, 128>}]} {
    %c0 = arith.constant 0 : index
    %c0_0 = arith.constant 0 : index
    %c0_1 = arith.constant 0 : index
    %0 = vector.load %arg1[%c0, %c0_0, %c0_1] : memref<1x64x16xf32, #tpu.memory_space<vmem>>, vector<1x64x16xf32>
    %1 = vector.shape_cast %0 : vector<1x64x16xf32> to vector<64x16xf32>
    %2 = arith.truncf %1 : vector<64x16xf32> to vector<64x16xbf16>
    %c0_2 = arith.constant 0 : index
    %c0_3 = arith.constant 0 : index
    %3 = vector.load %arg2[%c0_2, %c0_3] : memref<16x128xbf16, #tpu.memory_space<vmem>>, vector<16x128xbf16>
    %cst = arith.constant dense<0.000000e+00> : vector<64x128xf32>
    %4 = tpu.matmul %2, %3, %cst {dimension_numbers = #tpu.dot_dimension_numbers<[1], [0], [0], [1], [0, 0, 1, 1], [], []>} : vector<64x16xbf16>, vector<16x128xbf16>, vector<64x128xf32> -> vector<64x128xf32>
    %c0_4 = arith.constant 0 : index
    %c0_5 = arith.constant 0 : index
    %5 = vector.load %arg4[%c0_4, %c0_5] : memref<1x128xf32, #tpu.memory_space<vmem>>, vector<1x128xf32>
    %6 = vector.broadcast %5 : vector<1x128xf32> to vector<64x128xf32>
    %7 = arith.addf %4, %6 : vector<64x128xf32>
    %c0_6 = arith.constant 0 : index
    %c0_7 = arith.constant 0 : index
    %8 = vector.load %arg12[%c0_6, %c0_7] : memref<64x128xf32, #tpu.memory_space<vmem>>, vector<64x128xf32>
    tpu.vector_store %arg12[%c0_6, %c0_7], %7 {strides = array<i32>} : memref<64x128xf32, #tpu.memory_space<vmem>>, vector<64x128xf32>,
    %cst_8 = arith.constant 0.000000e+00 : f32
    %9 = vector.broadcast %cst_8 : f32 to vector<8x128xf32>
    %c0_i32 = arith.constant 0 : i32
    %c8_i32 = arith.constant 8 : i32
    %10 = arith.muli %c0_i32, %c8_i32 : i32
    %11 = tpu.assume_multiple %10, 8 : i32
    %12 = arith.index_cast %11 : i32 to index
    %c0_9 = arith.constant 0 : index
    %13 = vector.load %arg12[%12, %c0_9] : memref<64x128xf32, #tpu.memory_space<vmem>>, vector<8x128xf32>
    %14 = arith.truncf %9 : vector<8x128xf32> to vector<8x128xbf16>
    %c0_10 = arith.constant 0 : index
    %c0_11 = arith.constant 0 : index
    %15 = vector.load %arg3[%c0_10, %c0_11] : memref<128x128xbf16, #tpu.memory_space<vmem>>, vector<128x128xbf16>
    %cst_12 = arith.constant dense<0.000000e+00> : vector<8x128xf32>
    %16 = tpu.matmul %14, %15, %cst_12 {dimension_numbers = #tpu.dot_dimension_numbers<[1], [0], [0], [1], [0, 0, 1, 1], [], []>} : vector<8x128xbf16>, vector<128x128xbf16>, vector<8x128xf32> -> vector<8x128xf32>
    %17 = arith.addf %13, %16 : vector<8x128xf32>
    %18 = math.tanh %17 : vector<8x128xf32>
    %19 = arith.index_cast %11 : i32 to index
    %c0_13 = arith.constant 0 : index
    %20 = vector.load %arg11[%19, %c0_13] : memref<64x128xf32, #tpu.memory_space<vmem>>, vector<8x128xf32>
    tpu.vector_store %arg11[%19, %c0_13], %18 {strides = array<i32>} : memref<64x128xf32, #tpu.memory_space<vmem>>, vector<8x128xf32>,
    %c1_i32 = arith.constant 1 : i32
    %c8_i32_14 = arith.constant 8 : i32
    %21 = arith.muli %c1_i32, %c8_i32_14 : i32
    %22 = tpu.assume_multiple %21, 8 : i32
    %23 = arith.index_cast %22 : i32 to index
    %c0_15 = arith.constant 0 : index
    %24 = vector.load %arg12[%23, %c0_15] : memref<64x128xf32, #tpu.memory_space<vmem>>, vector<8x128xf32>
    %25 = arith.truncf %18 : vector<8x128xf32> to vector<8x128xbf16>
    %c0_16 = arith.constant 0 : index
    %c0_17 = arith.constant 0 : index
    %26 = vector.load %arg3[%c0_16, %c0_17] : memref<128x128xbf16, #tpu.memory_space<vmem>>, vector<128x128xbf16>
    %cst_18 = arith.constant dense<0.000000e+00> : vector<8x128xf32>
    %27 = tpu.matmul %25, %26, %cst_18 {dimension_numbers = #tpu.dot_dimension_numbers<[1], [0], [0], [1], [0, 0, 1, 1], [], []>} : vector<8x128xbf16>, vector<128x128xbf16>, vector<8x128xf32> -> vector<8x128xf32>
    %28 = arith.addf %24, %27 : vector<8x128xf32>
    %29 = math.tanh %28 : vector<8x128xf32>
    %30 = arith.index_cast %22 : i32 to index
    %c0_19 = arith.constant 0 : index
    %31 = vector.load %arg11[%30, %c0_19] : memref<64x128xf32, #tpu.memory_space<vmem>>, vector<8x128xf32>
    tpu.vector_store %arg11[%30, %c0_19], %29 {strides = array<i32>} : memref<64x128xf32, #tpu.memory_space<vmem>>, vector<8x128xf32>,
    %c2_i32 = arith.constant 2 : i32
    %c8_i32_20 = arith.constant 8 : i32
    %32 = arith.muli %c2_i32, %c8_i32_20 : i32
    %33 = tpu.assume_multiple %32, 8 : i32
    %34 = arith.index_cast %33 : i32 to index
    %c0_21 = arith.constant 0 : index
    %35 = vector.load %arg12[%34, %c0_21] : memref<64x128xf32, #tpu.memory_space<vmem>>, vector<8x128xf32>
    %36 = arith.truncf %29 : vector<8x128xf32> to vector<8x128xbf16>
    %c0_22 = arith.constant 0 : index
    %c0_23 = arith.constant 0 : index
    %37 = vector.load %arg3[%c0_22, %c0_23] : memref<128x128xbf16, #tpu.memory_space<vmem>>, vector<128x128xbf16>
    %cst_24 = arith.constant dense<0.000000e+00> : vector<8x128xf32>
    %38 = tpu.matmul %36, %37, %cst_24 {dimension_numbers = #tpu.dot_dimension_numbers<[1], [0], [0], [1], [0, 0, 1, 1], [], []>} : vector<8x128xbf16>, vector<128x128xbf16>, vector<8x128xf32> -> vector<8x128xf32>
    %39 = arith.addf %35, %38 : vector<8x128xf32>
    %40 = math.tanh %39 : vector<8x128xf32>
    %41 = arith.index_cast %33 : i32 to index
    %c0_25 = arith.constant 0 : index
    %42 = vector.load %arg11[%41, %c0_25] : memref<64x128xf32, #tpu.memory_space<vmem>>, vector<8x128xf32>
    tpu.vector_store %arg11[%41, %c0_25], %40 {strides = array<i32>} : memref<64x128xf32, #tpu.memory_space<vmem>>, vector<8x128xf32>,
    %c3_i32 = arith.constant 3 : i32
    %c8_i32_26 = arith.constant 8 : i32
    %43 = arith.muli %c3_i32, %c8_i32_26 : i32
    %44 = tpu.assume_multiple %43, 8 : i32
    %45 = arith.index_cast %44 : i32 to index
    %c0_27 = arith.constant 0 : index
    %46 = vector.load %arg12[%45, %c0_27] : memref<64x128xf32, #tpu.memory_space<vmem>>, vector<8x128xf32>
    %47 = arith.truncf %40 : vector<8x128xf32> to vector<8x128xbf16>
    %c0_28 = arith.constant 0 : index
    %c0_29 = arith.constant 0 : index
    %48 = vector.load %arg3[%c0_28, %c0_29] : memref<128x128xbf16, #tpu.memory_space<vmem>>, vector<128x128xbf16>
    %cst_30 = arith.constant dense<0.000000e+00> : vector<8x128xf32>
    %49 = tpu.matmul %47, %48, %cst_30 {dimension_numbers = #tpu.dot_dimension_numbers<[1], [0], [0], [1], [0, 0, 1, 1], [], []>} : vector<8x128xbf16>, vector<128x128xbf16>, vector<8x128xf32> -> vector<8x128xf32>
    %50 = arith.addf %46, %49 : vector<8x128xf32>
    %51 = math.tanh %50 : vector<8x128xf32>
    %52 = arith.index_cast %44 : i32 to index
    %c0_31 = arith.constant 0 : index
    %53 = vector.load %arg11[%52, %c0_31] : memref<64x128xf32, #tpu.memory_space<vmem>>, vector<8x128xf32>
    tpu.vector_store %arg11[%52, %c0_31], %51 {strides = array<i32>} : memref<64x128xf32, #tpu.memory_space<vmem>>, vector<8x128xf32>,
    %c4_i32 = arith.constant 4 : i32
    %c8_i32_32 = arith.constant 8 : i32
    %54 = arith.muli %c4_i32, %c8_i32_32 : i32
    %55 = tpu.assume_multiple %54, 8 : i32
    %56 = arith.index_cast %55 : i32 to index
    %c0_33 = arith.constant 0 : index
    %57 = vector.load %arg12[%56, %c0_33] : memref<64x128xf32, #tpu.memory_space<vmem>>, vector<8x128xf32>
    %58 = arith.truncf %51 : vector<8x128xf32> to vector<8x128xbf16>
    %c0_34 = arith.constant 0 : index
    %c0_35 = arith.constant 0 : index
    %59 = vector.load %arg3[%c0_34, %c0_35] : memref<128x128xbf16, #tpu.memory_space<vmem>>, vector<128x128xbf16>
    %cst_36 = arith.constant dense<0.000000e+00> : vector<8x128xf32>
    %60 = tpu.matmul %58, %59, %cst_36 {dimension_numbers = #tpu.dot_dimension_numbers<[1], [0], [0], [1], [0, 0, 1, 1], [], []>} : vector<8x128xbf16>, vector<128x128xbf16>, vector<8x128xf32> -> vector<8x128xf32>
    %61 = arith.addf %57, %60 : vector<8x128xf32>
    %62 = math.tanh %61 : vector<8x128xf32>
    %63 = arith.index_cast %55 : i32 to index
    %c0_37 = arith.constant 0 : index
    %64 = vector.load %arg11[%63, %c0_37] : memref<64x128xf32, #tpu.memory_space<vmem>>, vector<8x128xf32>
    tpu.vector_store %arg11[%63, %c0_37], %62 {strides = array<i32>} : memref<64x128xf32, #tpu.memory_space<vmem>>, vector<8x128xf32>,
    %c5_i32 = arith.constant 5 : i32
    %c8_i32_38 = arith.constant 8 : i32
    %65 = arith.muli %c5_i32, %c8_i32_38 : i32
    %66 = tpu.assume_multiple %65, 8 : i32
    %67 = arith.index_cast %66 : i32 to index
    %c0_39 = arith.constant 0 : index
    %68 = vector.load %arg12[%67, %c0_39] : memref<64x128xf32, #tpu.memory_space<vmem>>, vector<8x128xf32>
    %69 = arith.truncf %62 : vector<8x128xf32> to vector<8x128xbf16>
    %c0_40 = arith.constant 0 : index
    %c0_41 = arith.constant 0 : index
    %70 = vector.load %arg3[%c0_40, %c0_41] : memref<128x128xbf16, #tpu.memory_space<vmem>>, vector<128x128xbf16>
    %cst_42 = arith.constant dense<0.000000e+00> : vector<8x128xf32>
    %71 = tpu.matmul %69, %70, %cst_42 {dimension_numbers = #tpu.dot_dimension_numbers<[1], [0], [0], [1], [0, 0, 1, 1], [], []>} : vector<8x128xbf16>, vector<128x128xbf16>, vector<8x128xf32> -> vector<8x128xf32>
    %72 = arith.addf %68, %71 : vector<8x128xf32>
    %73 = math.tanh %72 : vector<8x128xf32>
    %74 = arith.index_cast %66 : i32 to index
    %c0_43 = arith.constant 0 : index
    %75 = vector.load %arg11[%74, %c0_43] : memref<64x128xf32, #tpu.memory_space<vmem>>, vector<8x128xf32>
    tpu.vector_store %arg11[%74, %c0_43], %73 {strides = array<i32>} : memref<64x128xf32, #tpu.memory_space<vmem>>, vector<8x128xf32>,
    %c6_i32 = arith.constant 6 : i32
    %c8_i32_44 = arith.constant 8 : i32
    %76 = arith.muli %c6_i32, %c8_i32_44 : i32
    %77 = tpu.assume_multiple %76, 8 : i32
    %78 = arith.index_cast %77 : i32 to index
    %c0_45 = arith.constant 0 : index
    %79 = vector.load %arg12[%78, %c0_45] : memref<64x128xf32, #tpu.memory_space<vmem>>, vector<8x128xf32>
    %80 = arith.truncf %73 : vector<8x128xf32> to vector<8x128xbf16>
    %c0_46 = arith.constant 0 : index
    %c0_47 = arith.constant 0 : index
    %81 = vector.load %arg3[%c0_46, %c0_47] : memref<128x128xbf16, #tpu.memory_space<vmem>>, vector<128x128xbf16>
    %cst_48 = arith.constant dense<0.000000e+00> : vector<8x128xf32>
    %82 = tpu.matmul %80, %81, %cst_48 {dimension_numbers = #tpu.dot_dimension_numbers<[1], [0], [0], [1], [0, 0, 1, 1], [], []>} : vector<8x128xbf16>, vector<128x128xbf16>, vector<8x128xf32> -> vector<8x128xf32>
    %83 = arith.addf %79, %82 : vector<8x128xf32>
    %84 = math.tanh %83 : vector<8x128xf32>
    %85 = arith.index_cast %77 : i32 to index
    %c0_49 = arith.constant 0 : index
    %86 = vector.load %arg11[%85, %c0_49] : memref<64x128xf32, #tpu.memory_space<vmem>>, vector<8x128xf32>
    tpu.vector_store %arg11[%85, %c0_49], %84 {strides = array<i32>} : memref<64x128xf32, #tpu.memory_space<vmem>>, vector<8x128xf32>,
    %c7_i32 = arith.constant 7 : i32
    %c8_i32_50 = arith.constant 8 : i32
    %87 = arith.muli %c7_i32, %c8_i32_50 : i32
    %88 = tpu.assume_multiple %87, 8 : i32
    %89 = arith.index_cast %88 : i32 to index
    %c0_51 = arith.constant 0 : index
    %90 = vector.load %arg12[%89, %c0_51] : memref<64x128xf32, #tpu.memory_space<vmem>>, vector<8x128xf32>
    %91 = arith.truncf %84 : vector<8x128xf32> to vector<8x128xbf16>
    %c0_52 = arith.constant 0 : index
    %c0_53 = arith.constant 0 : index
    %92 = vector.load %arg3[%c0_52, %c0_53] : memref<128x128xbf16, #tpu.memory_space<vmem>>, vector<128x128xbf16>
    %cst_54 = arith.constant dense<0.000000e+00> : vector<8x128xf32>
    %93 = tpu.matmul %91, %92, %cst_54 {dimension_numbers = #tpu.dot_dimension_numbers<[1], [0], [0], [1], [0, 0, 1, 1], [], []>} : vector<8x128xbf16>, vector<128x128xbf16>, vector<8x128xf32> -> vector<8x128xf32>
    %94 = arith.addf %90, %93 : vector<8x128xf32>
    %95 = math.tanh %94 : vector<8x128xf32>
    %96 = arith.index_cast %88 : i32 to index
    %c0_55 = arith.constant 0 : index
    %97 = vector.load %arg11[%96, %c0_55] : memref<64x128xf32, #tpu.memory_space<vmem>>, vector<8x128xf32>
    tpu.vector_store %arg11[%96, %c0_55], %95 {strides = array<i32>} : memref<64x128xf32, #tpu.memory_space<vmem>>, vector<8x128xf32>,
    %c8_i32_56 = arith.constant 8 : i32
    %c0_57 = arith.constant 0 : index
    %c0_58 = arith.constant 0 : index
    %98 = vector.load %arg11[%c0_57, %c0_58] : memref<64x128xf32, #tpu.memory_space<vmem>>, vector<64x128xf32>
    %99 = arith.truncf %98 : vector<64x128xf32> to vector<64x128xbf16>
    %c0_59 = arith.constant 0 : index
    %c0_60 = arith.constant 0 : index
    %100 = vector.load %arg5[%c0_59, %c0_60] : memref<128x128xbf16, #tpu.memory_space<vmem>>, vector<128x128xbf16>
    %cst_61 = arith.constant dense<0.000000e+00> : vector<64x128xf32>
    %101 = tpu.matmul %99, %100, %cst_61 {dimension_numbers = #tpu.dot_dimension_numbers<[1], [0], [0], [1], [0, 0, 1, 1], [], []>} : vector<64x128xbf16>, vector<128x128xbf16>, vector<64x128xf32> -> vector<64x128xf32>
    %c0_62 = arith.constant 0 : index
    %c0_63 = arith.constant 0 : index
    %102 = vector.load %arg7[%c0_62, %c0_63] : memref<1x128xf32, #tpu.memory_space<vmem>>, vector<1x128xf32>
    %103 = vector.broadcast %102 : vector<1x128xf32> to vector<64x128xf32>
    %104 = arith.addf %101, %103 : vector<64x128xf32>
    %c0_64 = arith.constant 0 : index
    %c0_65 = arith.constant 0 : index
    %105 = vector.load %arg12[%c0_64, %c0_65] : memref<64x128xf32, #tpu.memory_space<vmem>>, vector<64x128xf32>
    tpu.vector_store %arg12[%c0_64, %c0_65], %104 {strides = array<i32>} : memref<64x128xf32, #tpu.memory_space<vmem>>, vector<64x128xf32>,
    %cst_66 = arith.constant 0.000000e+00 : f32
    %106 = vector.broadcast %cst_66 : f32 to vector<8x128xf32>
    %c0_i32_67 = arith.constant 0 : i32
    %c8_i32_68 = arith.constant 8 : i32
    %107 = arith.muli %c0_i32_67, %c8_i32_68 : i32
    %108 = tpu.assume_multiple %107, 8 : i32
    %109 = arith.index_cast %108 : i32 to index
    %c0_69 = arith.constant 0 : index
    %110 = vector.load %arg12[%109, %c0_69] : memref<64x128xf32, #tpu.memory_space<vmem>>, vector<8x128xf32>
    %111 = arith.truncf %106 : vector<8x128xf32> to vector<8x128xbf16>
    %c0_70 = arith.constant 0 : index
    %c0_71 = arith.constant 0 : index
    %112 = vector.load %arg6[%c0_70, %c0_71] : memref<128x128xbf16, #tpu.memory_space<vmem>>, vector<128x128xbf16>
    %cst_72 = arith.constant dense<0.000000e+00> : vector<8x128xf32>
    %113 = tpu.matmul %111, %112, %cst_72 {dimension_numbers = #tpu.dot_dimension_numbers<[1], [0], [0], [1], [0, 0, 1, 1], [], []>} : vector<8x128xbf16>, vector<128x128xbf16>, vector<8x128xf32> -> vector<8x128xf32>
    %114 = arith.addf %110, %113 : vector<8x128xf32>
    %115 = math.tanh %114 : vector<8x128xf32>
    %116 = arith.index_cast %108 : i32 to index
    %c0_73 = arith.constant 0 : index
    %117 = vector.load %arg11[%116, %c0_73] : memref<64x128xf32, #tpu.memory_space<vmem>>, vector<8x128xf32>
    tpu.vector_store %arg11[%116, %c0_73], %115 {strides = array<i32>} : memref<64x128xf32, #tpu.memory_space<vmem>>, vector<8x128xf32>,
    %c1_i32_74 = arith.constant 1 : i32
    %c8_i32_75 = arith.constant 8 : i32
    %118 = arith.muli %c1_i32_74, %c8_i32_75 : i32
    %119 = tpu.assume_multiple %118, 8 : i32
    %120 = arith.index_cast %119 : i32 to index
    %c0_76 = arith.constant 0 : index
    %121 = vector.load %arg12[%120, %c0_76] : memref<64x128xf32, #tpu.memory_space<vmem>>, vector<8x128xf32>
    %122 = arith.truncf %115 : vector<8x128xf32> to vector<8x128xbf16>
    %c0_77 = arith.constant 0 : index
    %c0_78 = arith.constant 0 : index
    %123 = vector.load %arg6[%c0_77, %c0_78] : memref<128x128xbf16, #tpu.memory_space<vmem>>, vector<128x128xbf16>
    %cst_79 = arith.constant dense<0.000000e+00> : vector<8x128xf32>
    %124 = tpu.matmul %122, %123, %cst_79 {dimension_numbers = #tpu.dot_dimension_numbers<[1], [0], [0], [1], [0, 0, 1, 1], [], []>} : vector<8x128xbf16>, vector<128x128xbf16>, vector<8x128xf32> -> vector<8x128xf32>
    %125 = arith.addf %121, %124 : vector<8x128xf32>
    %126 = math.tanh %125 : vector<8x128xf32>
    %127 = arith.index_cast %119 : i32 to index
    %c0_80 = arith.constant 0 : index
    %128 = vector.load %arg11[%127, %c0_80] : memref<64x128xf32, #tpu.memory_space<vmem>>, vector<8x128xf32>
    tpu.vector_store %arg11[%127, %c0_80], %126 {strides = array<i32>} : memref<64x128xf32, #tpu.memory_space<vmem>>, vector<8x128xf32>,
    %c2_i32_81 = arith.constant 2 : i32
    %c8_i32_82 = arith.constant 8 : i32
    %129 = arith.muli %c2_i32_81, %c8_i32_82 : i32
    %130 = tpu.assume_multiple %129, 8 : i32
    %131 = arith.index_cast %130 : i32 to index
    %c0_83 = arith.constant 0 : index
    %132 = vector.load %arg12[%131, %c0_83] : memref<64x128xf32, #tpu.memory_space<vmem>>, vector<8x128xf32>
    %133 = arith.truncf %126 : vector<8x128xf32> to vector<8x128xbf16>
    %c0_84 = arith.constant 0 : index
    %c0_85 = arith.constant 0 : index
    %134 = vector.load %arg6[%c0_84, %c0_85] : memref<128x128xbf16, #tpu.memory_space<vmem>>, vector<128x128xbf16>
    %cst_86 = arith.constant dense<0.000000e+00> : vector<8x128xf32>
    %135 = tpu.matmul %133, %134, %cst_86 {dimension_numbers = #tpu.dot_dimension_numbers<[1], [0], [0], [1], [0, 0, 1, 1], [], []>} : vector<8x128xbf16>, vector<128x128xbf16>, vector<8x128xf32> -> vector<8x128xf32>
    %136 = arith.addf %132, %135 : vector<8x128xf32>
    %137 = math.tanh %136 : vector<8x128xf32>
    %138 = arith.index_cast %130 : i32 to index
    %c0_87 = arith.constant 0 : index
    %139 = vector.load %arg11[%138, %c0_87] : memref<64x128xf32, #tpu.memory_space<vmem>>, vector<8x128xf32>
    tpu.vector_store %arg11[%138, %c0_87], %137 {strides = array<i32>} : memref<64x128xf32, #tpu.memory_space<vmem>>, vector<8x128xf32>,
    %c3_i32_88 = arith.constant 3 : i32
    %c8_i32_89 = arith.constant 8 : i32
    %140 = arith.muli %c3_i32_88, %c8_i32_89 : i32
    %141 = tpu.assume_multiple %140, 8 : i32
    %142 = arith.index_cast %141 : i32 to index
    %c0_90 = arith.constant 0 : index
    %143 = vector.load %arg12[%142, %c0_90] : memref<64x128xf32, #tpu.memory_space<vmem>>, vector<8x128xf32>
    %144 = arith.truncf %137 : vector<8x128xf32> to vector<8x128xbf16>
    %c0_91 = arith.constant 0 : index
    %c0_92 = arith.constant 0 : index
    %145 = vector.load %arg6[%c0_91, %c0_92] : memref<128x128xbf16, #tpu.memory_space<vmem>>, vector<128x128xbf16>
    %cst_93 = arith.constant dense<0.000000e+00> : vector<8x128xf32>
    %146 = tpu.matmul %144, %145, %cst_93 {dimension_numbers = #tpu.dot_dimension_numbers<[1], [0], [0], [1], [0, 0, 1, 1], [], []>} : vector<8x128xbf16>, vector<128x128xbf16>, vector<8x128xf32> -> vector<8x128xf32>
    %147 = arith.addf %143, %146 : vector<8x128xf32>
    %148 = math.tanh %147 : vector<8x128xf32>
    %149 = arith.index_cast %141 : i32 to index
    %c0_94 = arith.constant 0 : index
    %150 = vector.load %arg11[%149, %c0_94] : memref<64x128xf32, #tpu.memory_space<vmem>>, vector<8x128xf32>
    tpu.vector_store %arg11[%149, %c0_94], %148 {strides = array<i32>} : memref<64x128xf32, #tpu.memory_space<vmem>>, vector<8x128xf32>,
    %c4_i32_95 = arith.constant 4 : i32
    %c8_i32_96 = arith.constant 8 : i32
    %151 = arith.muli %c4_i32_95, %c8_i32_96 : i32
    %152 = tpu.assume_multiple %151, 8 : i32
    %153 = arith.index_cast %152 : i32 to index
    %c0_97 = arith.constant 0 : index
    %154 = vector.load %arg12[%153, %c0_97] : memref<64x128xf32, #tpu.memory_space<vmem>>, vector<8x128xf32>
    %155 = arith.truncf %148 : vector<8x128xf32> to vector<8x128xbf16>
    %c0_98 = arith.constant 0 : index
    %c0_99 = arith.constant 0 : index
    %156 = vector.load %arg6[%c0_98, %c0_99] : memref<128x128xbf16, #tpu.memory_space<vmem>>, vector<128x128xbf16>
    %cst_100 = arith.constant dense<0.000000e+00> : vector<8x128xf32>
    %157 = tpu.matmul %155, %156, %cst_100 {dimension_numbers = #tpu.dot_dimension_numbers<[1], [0], [0], [1], [0, 0, 1, 1], [], []>} : vector<8x128xbf16>, vector<128x128xbf16>, vector<8x128xf32> -> vector<8x128xf32>
    %158 = arith.addf %154, %157 : vector<8x128xf32>
    %159 = math.tanh %158 : vector<8x128xf32>
    %160 = arith.index_cast %152 : i32 to index
    %c0_101 = arith.constant 0 : index
    %161 = vector.load %arg11[%160, %c0_101] : memref<64x128xf32, #tpu.memory_space<vmem>>, vector<8x128xf32>
    tpu.vector_store %arg11[%160, %c0_101], %159 {strides = array<i32>} : memref<64x128xf32, #tpu.memory_space<vmem>>, vector<8x128xf32>,
    %c5_i32_102 = arith.constant 5 : i32
    %c8_i32_103 = arith.constant 8 : i32
    %162 = arith.muli %c5_i32_102, %c8_i32_103 : i32
    %163 = tpu.assume_multiple %162, 8 : i32
    %164 = arith.index_cast %163 : i32 to index
    %c0_104 = arith.constant 0 : index
    %165 = vector.load %arg12[%164, %c0_104] : memref<64x128xf32, #tpu.memory_space<vmem>>, vector<8x128xf32>
    %166 = arith.truncf %159 : vector<8x128xf32> to vector<8x128xbf16>
    %c0_105 = arith.constant 0 : index
    %c0_106 = arith.constant 0 : index
    %167 = vector.load %arg6[%c0_105, %c0_106] : memref<128x128xbf16, #tpu.memory_space<vmem>>, vector<128x128xbf16>
    %cst_107 = arith.constant dense<0.000000e+00> : vector<8x128xf32>
    %168 = tpu.matmul %166, %167, %cst_107 {dimension_numbers = #tpu.dot_dimension_numbers<[1], [0], [0], [1], [0, 0, 1, 1], [], []>} : vector<8x128xbf16>, vector<128x128xbf16>, vector<8x128xf32> -> vector<8x128xf32>
    %169 = arith.addf %165, %168 : vector<8x128xf32>
    %170 = math.tanh %169 : vector<8x128xf32>
    %171 = arith.index_cast %163 : i32 to index
    %c0_108 = arith.constant 0 : index
    %172 = vector.load %arg11[%171, %c0_108] : memref<64x128xf32, #tpu.memory_space<vmem>>, vector<8x128xf32>
    tpu.vector_store %arg11[%171, %c0_108], %170 {strides = array<i32>} : memref<64x128xf32, #tpu.memory_space<vmem>>, vector<8x128xf32>,
    %c6_i32_109 = arith.constant 6 : i32
    %c8_i32_110 = arith.constant 8 : i32
    %173 = arith.muli %c6_i32_109, %c8_i32_110 : i32
    %174 = tpu.assume_multiple %173, 8 : i32
    %175 = arith.index_cast %174 : i32 to index
    %c0_111 = arith.constant 0 : index
    %176 = vector.load %arg12[%175, %c0_111] : memref<64x128xf32, #tpu.memory_space<vmem>>, vector<8x128xf32>
    %177 = arith.truncf %170 : vector<8x128xf32> to vector<8x128xbf16>
    %c0_112 = arith.constant 0 : index
    %c0_113 = arith.constant 0 : index
    %178 = vector.load %arg6[%c0_112, %c0_113] : memref<128x128xbf16, #tpu.memory_space<vmem>>, vector<128x128xbf16>
    %cst_114 = arith.constant dense<0.000000e+00> : vector<8x128xf32>
    %179 = tpu.matmul %177, %178, %cst_114 {dimension_numbers = #tpu.dot_dimension_numbers<[1], [0], [0], [1], [0, 0, 1, 1], [], []>} : vector<8x128xbf16>, vector<128x128xbf16>, vector<8x128xf32> -> vector<8x128xf32>
    %180 = arith.addf %176, %179 : vector<8x128xf32>
    %181 = math.tanh %180 : vector<8x128xf32>
    %182 = arith.index_cast %174 : i32 to index
    %c0_115 = arith.constant 0 : index
    %183 = vector.load %arg11[%182, %c0_115] : memref<64x128xf32, #tpu.memory_space<vmem>>, vector<8x128xf32>
    tpu.vector_store %arg11[%182, %c0_115], %181 {strides = array<i32>} : memref<64x128xf32, #tpu.memory_space<vmem>>, vector<8x128xf32>,
    %c7_i32_116 = arith.constant 7 : i32
    %c8_i32_117 = arith.constant 8 : i32
    %184 = arith.muli %c7_i32_116, %c8_i32_117 : i32
    %185 = tpu.assume_multiple %184, 8 : i32
    %186 = arith.index_cast %185 : i32 to index
    %c0_118 = arith.constant 0 : index
    %187 = vector.load %arg12[%186, %c0_118] : memref<64x128xf32, #tpu.memory_space<vmem>>, vector<8x128xf32>
    %188 = arith.truncf %181 : vector<8x128xf32> to vector<8x128xbf16>
    %c0_119 = arith.constant 0 : index
    %c0_120 = arith.constant 0 : index
    %189 = vector.load %arg6[%c0_119, %c0_120] : memref<128x128xbf16, #tpu.memory_space<vmem>>, vector<128x128xbf16>
    %cst_121 = arith.constant dense<0.000000e+00> : vector<8x128xf32>
    %190 = tpu.matmul %188, %189, %cst_121 {dimension_numbers = #tpu.dot_dimension_numbers<[1], [0], [0], [1], [0, 0, 1, 1], [], []>} : vector<8x128xbf16>, vector<128x128xbf16>, vector<8x128xf32> -> vector<8x128xf32>
    %191 = arith.addf %187, %190 : vector<8x128xf32>
    %192 = math.tanh %191 : vector<8x128xf32>
    %193 = arith.index_cast %185 : i32 to index
    %c0_122 = arith.constant 0 : index
    %194 = vector.load %arg11[%193, %c0_122] : memref<64x128xf32, #tpu.memory_space<vmem>>, vector<8x128xf32>
    tpu.vector_store %arg11[%193, %c0_122], %192 {strides = array<i32>} : memref<64x128xf32, #tpu.memory_space<vmem>>, vector<8x128xf32>,
    %c8_i32_123 = arith.constant 8 : i32
    %c0_124 = arith.constant 0 : index
    %c0_125 = arith.constant 0 : index
    %195 = vector.load %arg11[%c0_124, %c0_125] : memref<64x128xf32, #tpu.memory_space<vmem>>, vector<64x128xf32>
    %196 = arith.truncf %195 : vector<64x128xf32> to vector<64x128xbf16>
    %c0_126 = arith.constant 0 : index
    %c0_127 = arith.constant 0 : index
    %197 = vector.load %arg8[%c0_126, %c0_127] : memref<128x128xbf16, #tpu.memory_space<vmem>>, vector<128x128xbf16>
    %cst_128 = arith.constant dense<0.000000e+00> : vector<64x128xf32>
    %198 = tpu.matmul %196, %197, %cst_128 {dimension_numbers = #tpu.dot_dimension_numbers<[1], [0], [0], [1], [0, 0, 1, 1], [], []>} : vector<64x128xbf16>, vector<128x128xbf16>, vector<64x128xf32> -> vector<64x128xf32>
    %c0_129 = arith.constant 0 : index
    %c0_130 = arith.constant 0 : index
    %199 = vector.load %arg9[%c0_129, %c0_130] : memref<1x128xf32, #tpu.memory_space<vmem>>, vector<1x128xf32>
    %200 = vector.broadcast %199 : vector<1x128xf32> to vector<64x128xf32>
    %201 = arith.addf %198, %200 : vector<64x128xf32>
    %c0_131 = arith.constant 0 : index
    %c0_132 = arith.constant 0 : index
    %c0_133 = arith.constant 0 : index
    %202 = vector.load %arg10[%c0_131, %c0_132, %c0_133] : memref<1x64x128xf32, #tpu.memory_space<vmem>>, vector<1x64x128xf32>
    %203 = vector.shape_cast %202 : vector<1x64x128xf32> to vector<64x128xf32>
    %204 = vector.shape_cast %201 : vector<64x128xf32> to vector<1x64x128xf32>
    tpu.vector_store %arg10[%c0_131, %c0_132, %c0_133], %204 {strides = array<i32>} : memref<1x64x128xf32, #tpu.memory_space<vmem>>, vector<1x64x128xf32>,
    return
  }
  func.func @transform_0(%arg0: i32) -> (i32, i32, i32) {
    %c0_i32 = arith.constant 0 : i32
    %c0_i32_0 = arith.constant 0 : i32
    %c0_i32_1 = arith.constant 0 : i32
    return %arg0, %c0_i32, %c0_i32_0 : i32, i32, i32
  }
  func.func @transform_1(%arg0: i32) -> (i32, i32) {
    %c0_i32 = arith.constant 0 : i32
    %c0_i32_0 = arith.constant 0 : i32
    %c0_i32_1 = arith.constant 0 : i32
    return %c0_i32, %c0_i32_0 : i32, i32
  }
  func.func @transform_2(%arg0: i32) -> (i32, i32) {
    %c0_i32 = arith.constant 0 : i32
    %c0_i32_0 = arith.constant 0 : i32
    %c0_i32_1 = arith.constant 0 : i32
    return %c0_i32, %c0_i32_0 : i32, i32
  }
  func.func @transform_3(%arg0: i32) -> (i32, i32) {
    %c0_i32 = arith.constant 0 : i32
    %c0_i32_0 = arith.constant 0 : i32
    %c0_i32_1 = arith.constant 0 : i32
    return %c0_i32, %c0_i32_0 : i32, i32
  }
  func.func @transform_4(%arg0: i32) -> (i32, i32) {
    %c0_i32 = arith.constant 0 : i32
    %c0_i32_0 = arith.constant 0 : i32
    %c0_i32_1 = arith.constant 0 : i32
    return %c0_i32, %c0_i32_0 : i32, i32
  }
  func.func @transform_5(%arg0: i32) -> (i32, i32) {
    %c0_i32 = arith.constant 0 : i32
    %c0_i32_0 = arith.constant 0 : i32
    %c0_i32_1 = arith.constant 0 : i32
    return %c0_i32, %c0_i32_0 : i32, i32
  }
  func.func @transform_6(%arg0: i32) -> (i32, i32) {
    %c0_i32 = arith.constant 0 : i32
    %c0_i32_0 = arith.constant 0 : i32
    %c0_i32_1 = arith.constant 0 : i32
    return %c0_i32, %c0_i32_0 : i32, i32
  }
  func.func @transform_7(%arg0: i32) -> (i32, i32) {
    %c0_i32 = arith.constant 0 : i32
    %c0_i32_0 = arith.constant 0 : i32
    %c0_i32_1 = arith.constant 0 : i32
    return %c0_i32, %c0_i32_0 : i32, i32
  }
  func.func @transform_8(%arg0: i32) -> (i32, i32) {
    %c0_i32 = arith.constant 0 : i32
    %c0_i32_0 = arith.constant 0 : i32
    %c0_i32_1 = arith.constant 0 : i32
    return %c0_i32, %c0_i32_0 : i32, i32
  }
  func.func @transform_9(%arg0: i32) -> (i32, i32, i32) {
    %c0_i32 = arith.constant 0 : i32
    %c0_i32_0 = arith.constant 0 : i32
    %c0_i32_1 = arith.constant 0 : i32
    return %arg0, %c0_i32, %c0_i32_0 : i32, i32, i32
  }
}

</mosaic_0001>

<bundles_post_ra>
// kernel: tpu_custom_call.1
= control target key start
LH: loop header
LB: loop body
LE: loop exit
PB: predicated region body
PF: predicated region fallthrough
CT: control target
= control target key end

     0   :  { %14 = vsyncpa [#allocation5], 0  ;;  %s2982_s0 = inlined_call_operand.vmem [shape: f32[1,64,16], index: 0, kind: input, shape index: {}]   ;;  %s2983_s1 = inlined_call_operand.vmem [shape: bf16[16,128], index: 1, kind: input, shape index: {}]   ;;  %s2984_s2 = inlined_call_operand.vmem [shape: bf16[128,128], index: 2, kind: input, shape index: {}]   ;;  %s2985_s3 = inlined_call_operand.vmem [shape: f32[1,128], index: 3, kind: input, shape index: {}]   ;;  %s2986_s4 = inlined_call_operand.hbm [shape: bf16[128,128], index: 4, kind: input, shape index: {}]   ;;  %s2987_s5 = inlined_call_operand.hbm [shape: bf16[128,128], index: 5, kind: input, shape index: {}]   ;;  %s2988_s6 = inlined_call_operand.vmem [shape: f32[1,128], index: 6, kind: input, shape index: {}]   ;;  %s2989_s7 = inlined_call_operand.hbm [shape: bf16[128,128], index: 7, kind: input, shape index: {}]   ;;  %s2990_s8 = inlined_call_operand.vmem [shape: f32[1,128], index: 8, kind: input, shape index: {}]   ;;  %s2991_s9 = inlined_call_operand.hbm [shape: f32[1,64,128], index: 9, kind: output, shape index: {}]  }
   0x1   :  { %15 = vsyncpa [#allocation8], 0 }
   0x2   :  { %16 = vsyncpa [#allocation6], 0  ;;  %s42_s11 = sshll.u32 %s2987_s5, 4  ;;  %s2609_s12 = smov [#allocation7]   ;;  %s43_s11 = int_to_ptr.hbm [resolvable:$true] %s42_s11 }
   0x3   :  { %s44_s13 = sshll.u32 %s2609_s12, 4  ;;  %s29_s16 = sshll.u32 %s2986_s4, 4  ;;  %s45_s13 = int_to_ptr.vmem [resolvable:$true] %s44_s13  ;;  %s30_s16 = int_to_ptr.hbm [resolvable:$true] %s29_s16 }
   0x4   :  { %s2610_s17 = smov 64   ;;  %s2611_s18 = smov 4  }
   0x5   :  { %50 = dma.hbm_to_vmem [thread:$0]  %s43_s11, 1024, %s45_s13, [#allocation8], %s2610_s17, %s2610_s17, %s2611_s18  }
   0x6   :  { %s2612_s19 = smov [#allocation4]   ;;  %s57_s23 = sshll.u32 %s2989_s7, 4  ;;  %s58_s23 = int_to_ptr.hbm [resolvable:$true] %s57_s23 }
   0x7   :  { %s31_s20 = sshll.u32 %s2612_s19, 4  ;;  %s2613_s5 = smov [#allocation9]   ;;  %s32_s20 = int_to_ptr.vmem [resolvable:$true] %s31_s20 }
   0x8   :  { %37 = dma.hbm_to_vmem [thread:$0]  %s30_s16, 1024, %s32_s20, [#allocation5], %s2610_s17, %s2610_s17, %s2611_s18  }
   0x9   :  { %s59_s24 = sshll.u32 %s2613_s5, 4  ;;  %s60_s24 = int_to_ptr.vmem [resolvable:$true] %s59_s24 }
   0xa   :  { %65 = dma.hbm_to_vmem [thread:$0]  %s58_s23, 1024, %s60_s24, [#allocation8], %s2610_s17, %s2610_s17, %s2611_s18  }
   0xb   :  { %2603 = dma.done.wait [#allocation5], 1024  }
   0xc   :  { %2604 = vsyncadd [#allocation5], 4294966272 }
   0xd   :  { %2605 = dma.done.wait [#allocation8], 2048  }
   0xe   :  { %2606 = vsyncadd [#allocation8], 4294965248  ;;  %v2317_v0 = vld [vmem:[%s2983_s1] sm:$0xff]  ;;  %v82_v2 = vld [vmem:[%s2982_s0 + $0x8] sm:$0xff]  ;;  %vm105_vm0 = vcmask 130048   ;;  %v2614_v15 = vmov 0  }
   0xf   :  { %v81_v1 = vld [vmem:[%s2982_s0] sm:$0xff]  ;;  %v2325_v4 = vld [vmem:[%s2984_s2 + $0x38] sm:$0xff]  ;;  %125 = vmatpush.bf16.msra.mxu1 %v2317_v0  ;;  %2462 = vmatpush.bf16.msra.mxu2 %v2317_v0  ;;  %v2324_v5 = vld [vmem:[%s2984_s2 + $0x30] sm:$0xff]  ;;  %s2616_s21 = smov 128   ;;  %s2617_s22 = smov 8  }
  0x10   :  { %v89_v3 = vpack.c.bf16 %v82_v2, %v81_v1  ;;  %v2323_v6 = vld [vmem:[%s2984_s2 + $0x28] sm:$0xff]  ;;  %v2322_v7 = vld [vmem:[%s2984_s2 + $0x20] sm:$0xff]  ;;  %v83_v8 = vld [vmem:[%s2982_s0 + $0x10] sm:$0xff] }
  0x11   :  { %v84_v9 = vld [vmem:[%s2982_s0 + $0x18] sm:$0xff]  ;;  %v2320_v12 = vld [vmem:[%s2984_s2 + $0x10] sm:$0xff]  ;;  %v2319_v13 = vld [vmem:[%s2984_s2 + $0x8] sm:$0xff] }
  0x12   :  { %1737 = vmatmul.msk.bf16.vlgmr.msra.gmra.mxu1 %vm105_vm0, %v89_v3  ;;  %v2321_v10 = vld [vmem:[%s2984_s2 + $0x18] sm:$0xff]  ;;  %v90_v11 = vpack.c.bf16 %v84_v9, %v83_v8  ;;  %v2318_v14 = vld [vmem:[%s2984_s2] sm:$0xff]  ;;  %v86_v17 = vld [vmem:[%s2982_s0 + $0x28] sm:$0xff] }
  0x13   :  { %220 = vmatpush.bf16.msrb.mxu1 %v2325_v4  ;;  %v85_v16 = vld [vmem:[%s2982_s0 + $0x20] sm:$0xff]  ;;  %v2333_v19 = vld [vmem:[%s2984_s2 + $0x38] sm:$0xff]  ;;  %v2332_v20 = vld [vmem:[%s2984_s2 + $0x30] sm:$0xff] }
  0x14   :  { %v91_v18 = vpack.c.bf16 %v86_v17, %v85_v16  ;;  %303 = vmatpush.bf16.msrb.mxu2 %v2333_v19  ;;  %v87_v21 = vld [vmem:[%s2982_s0 + $0x30] sm:$0xff]  ;;  %v88_v22 = vld [vmem:[%s2982_s0 + $0x38] sm:$0xff]  ;;  %v2331_v23 = vld [vmem:[%s2984_s2 + $0x28] sm:$0xff]  ;;  %s1719_s0 = sshll.u32 %s2991_s9, 4  ;;  %s1720_s0 = int_to_ptr.hbm [resolvable:$true] %s1719_s0 }
  0x15   :  { %v92_v24 = vpack.c.bf16 %v88_v22, %v87_v21  ;;  %v2330_v25 = vld [vmem:[%s2984_s2 + $0x20] sm:$0xff]  ;;  %v2329_v26 = vld [vmem:[%s2984_s2 + $0x18] sm:$0xff]  ;;  %v2328_v27 = vld [vmem:[%s2984_s2 + $0x10] sm:$0xff] }
  0x16   :  { %1739 = vmatmul.msk.bf16.vlgmr.msra.gmra.mxu2 %vm105_vm0, %v91_v18  ;;  %v2327_v29 = vld [vmem:[%s2984_s2 + $0x8] sm:$0xff]  ;;  %v2326_v30 = vld [vmem:[%s2984_s2] sm:$0xff]  ;;  %v2341_v41 = vld [vmem:[%s2984_s2 + $0x38] sm:$0xff] }
  0x17   :  { %221 = vmatpush.bf16.msrb.mxu1 %v2324_v5  ;;  %v2764_v34 = vld [vmem:[%s2985_s3] ss:$0 sm:$0xff]  ;;  %387 = vmatpush.bf16.msra.mxu3 %v2341_v41  ;;  %v2340_v42 = vld [vmem:[%s2984_s2 + $0x30] sm:$0xff]  ;;  %v2339_v43 = vld [vmem:[%s2984_s2 + $0x28] sm:$0xff] }
  0x18   :  { %304 = vmatpush.bf16.msrb.mxu2 %v2332_v20  ;;  %v2338_v44 = vld [vmem:[%s2984_s2 + $0x20] sm:$0xff]  ;;  %v2337_v45 = vld [vmem:[%s2984_s2 + $0x18] sm:$0xff]  ;;  %v2336_v47 = vld [vmem:[%s2984_s2 + $0x10] sm:$0xff] }
  0x19   :  { %v2335_v48 = vld [vmem:[%s2984_s2 + $0x8] sm:$0xff]  ;;  %v2334_v50 = vld [vmem:[%s2984_s2] sm:$0xff]  ;;  %v2349_v51 = vld [vmem:[%s2984_s2 + $0x38] sm:$0xff] }
  0x1a   :  { %v2348_v53 = vld [vmem:[%s2984_s2 + $0x30] sm:$0xff]  ;;  %v2347_v54 = vld [vmem:[%s2984_s2 + $0x28] sm:$0xff]  ;;  %v2346_v55 = vld [vmem:[%s2984_s2 + $0x20] sm:$0xff] }
  0x1b   :  { %222 = vmatpush.bf16.msrb.mxu1 %v2323_v6  ;;  %388 = vmatpush.bf16.msra.mxu3 %v2340_v42  ;;  %v2345_v57 = vld [vmem:[%s2984_s2 + $0x18] sm:$0xff]  ;;  %v2344_v0 = vld [vmem:[%s2984_s2 + $0x10] sm:$0xff]  ;;  %v2343_v1 = vld [vmem:[%s2984_s2 + $0x8] sm:$0xff] }
  0x1c   :  { %305 = vmatpush.bf16.msrb.mxu2 %v2331_v23  ;;  %v2342_v2 = vld [vmem:[%s2984_s2] sm:$0xff]  ;;  %v2357_v3 = vld [vmem:[%s2984_s2 + $0x38] sm:$0xff]  ;;  %v2356_v4 = vld [vmem:[%s2984_s2 + $0x30] sm:$0xff] }
  0x1d   :  { %v2355_v5 = vld [vmem:[%s2984_s2 + $0x28] sm:$0xff]  ;;  %v2354_v6 = vld [vmem:[%s2984_s2 + $0x20] sm:$0xff]  ;;  %v2352_v8 = vld [vmem:[%s2984_s2 + $0x10] sm:$0xff] }
  0x1e   :  { %v2388_v19 = vld [vmem:[#allocation4 + $0x30] sm:$0xff]  ;;  %v2387_v20 = vld [vmem:[#allocation4 + $0x28] sm:$0xff]  ;;  %v2386_v21 = vld [vmem:[#allocation4 + $0x20] sm:$0xff] }
  0x1f   :  { %223 = vmatpush.bf16.msrb.mxu1 %v2322_v7  ;;  %389 = vmatpush.bf16.msra.mxu3 %v2339_v43  ;;  %v2353_v7 = vld [vmem:[%s2984_s2 + $0x18] sm:$0xff]  ;;  %v2384_v23 = vld [vmem:[#allocation4 + $0x10] sm:$0xff]  ;;  %v2359_v41 = vld [vmem:[%s2984_s2 + $0x8] sm:$0xff] }
  0x20   :  { %306 = vmatpush.bf16.msrb.mxu2 %v2330_v25  ;;  %v2385_v22 = vld [vmem:[#allocation4 + $0x18] sm:$0xff]  ;;  %v2382_v25 = vld [vmem:[#allocation4] sm:$0xff] }
  0x21   :  { %v2397_v42 = vld [vmem:[#allocation7 + $0x38] sm:$0xff] }
  0x22   :  { %1738 = vmatmul.msk.bf16.gmra.mxu1 %vm105_vm0, %v90_v11 }
  0x23   :  { %224 = vmatpush.bf16.msrb.mxu1 %v2321_v10  ;;  %390 = vmatpush.bf16.msra.mxu3 %v2338_v44  ;;  %v2396_v44 = vld [vmem:[#allocation7 + $0x30] sm:$0xff] }
  0x24   :  { %307 = vmatpush.bf16.msrb.mxu2 %v2329_v26 }
  0x26   :  { %1740 = vmatmul.msk.bf16.gmra.mxu2 %vm105_vm0, %v92_v24  ;;  %v2383_v24 = vld [vmem:[#allocation4 + $0x8] sm:$0xff] }
  0x27   :  { %225 = vmatpush.bf16.msrb.mxu1 %v2320_v12  ;;  %391 = vmatpush.bf16.msra.mxu3 %v2337_v45  ;;  %v2351_v12 = vld [vmem:[%s2984_s2 + $0x8] sm:$0xff] }
  0x28   :  { %308 = vmatpush.bf16.msrb.mxu2 %v2328_v27  ;;  %v2395_v45 = vld [vmem:[#allocation7 + $0x28] sm:$0xff] }
  0x2b   :  { %226 = vmatpush.bf16.msrb.mxu1 %v2319_v13  ;;  %392 = vmatpush.bf16.msra.mxu3 %v2336_v47  ;;  %v2350_v13 = vld [vmem:[%s2984_s2] sm:$0xff] }
  0x2c   :  { %309 = vmatpush.bf16.msrb.mxu2 %v2327_v29  ;;  %v2394_v47 = vld [vmem:[#allocation7 + $0x20] sm:$0xff] }
  0x2f   :  { %227 = vmatpush.bf16.msrb.mxu1 %v2318_v14  ;;  %393 = vmatpush.bf16.msra.mxu3 %v2335_v48  ;;  %v2389_v14 = vld [vmem:[#allocation4 + $0x38] sm:$0xff] }
  0x30   :  { %310 = vmatpush.bf16.msrb.mxu2 %v2326_v30  ;;  %v2393_v48 = vld [vmem:[#allocation7 + $0x18] sm:$0xff] }
  0x32   :  { %228 = vmatmul.bf16.vlgmr.msrb.gmra.mxu1 %v2614_v15 }
  0x33   :  { %394 = vmatpush.bf16.msra.mxu3 %v2334_v50  ;;  %471 = vmatpush.bf16.msra.mxu1 %v2349_v51  ;;  %v2392_v50 = vld [vmem:[#allocation7 + $0x10] sm:$0xff]  ;;  %v2391_v51 = vld [vmem:[#allocation7 + $0x8] sm:$0xff] }
  0x34   :  { %555 = vmatpush.bf16.msra.mxu2 %v2357_v3  ;;  %v2366_v3 = vld [vmem:[%s2984_s2] sm:$0xff] }
  0x37   :  { %472 = vmatpush.bf16.msra.mxu1 %v2348_v53  ;;  %v2390_v53 = vld [vmem:[#allocation7] sm:$0xff] }
  0x38   :  { %556 = vmatpush.bf16.msra.mxu2 %v2356_v4  ;;  %v2405_v4 = vld [vmem:[#allocation7 + $0x38] sm:$0xff] }
  0x3b   :  { %473 = vmatpush.bf16.msra.mxu1 %v2347_v54 }
  0x3c   :  { %557 = vmatpush.bf16.msra.mxu2 %v2355_v5  ;;  %v2404_v5 = vld [vmem:[#allocation7 + $0x30] sm:$0xff] }
  0x3f   :  { %474 = vmatpush.bf16.msra.mxu1 %v2346_v55 }
  0x40   :  { %558 = vmatpush.bf16.msra.mxu2 %v2354_v6  ;;  %v2403_v6 = vld [vmem:[#allocation7 + $0x28] sm:$0xff] }
  0x43   :  { %475 = vmatpush.bf16.msra.mxu1 %v2345_v57 }
  0x44   :  { %559 = vmatpush.bf16.msra.mxu2 %v2353_v7  ;;  %v2402_v7 = vld [vmem:[#allocation7 + $0x20] sm:$0xff] }
  0x47   :  { %476 = vmatpush.bf16.msra.mxu1 %v2344_v0  ;;  %v2369_v0 = vld [vmem:[%s2984_s2 + $0x18] sm:$0xff] }
  0x48   :  { %560 = vmatpush.bf16.msra.mxu2 %v2352_v8  ;;  %v2400_v8 = vld [vmem:[#allocation7 + $0x10] sm:$0xff] }
  0x4b   :  { %477 = vmatpush.bf16.msra.mxu1 %v2343_v1  ;;  %v2368_v1 = vld [vmem:[%s2984_s2 + $0x10] sm:$0xff] }
  0x4c   :  { %561 = vmatpush.bf16.msra.mxu2 %v2351_v12  ;;  %v2380_v12 = vld [vmem:[%s2984_s2 + $0x30] sm:$0xff] }
  0x4f   :  { %478 = vmatpush.bf16.msra.mxu1 %v2342_v2  ;;  %v2367_v2 = vld [vmem:[%s2984_s2 + $0x8] sm:$0xff] }
  0x50   :  { %562 = vmatpush.bf16.msra.mxu2 %v2350_v13 }
  0x8f   :  { %v127_v28 = vpop.f32.mrf.mxu1 }
  0x90   :  { %v128_v35 = vadd.f32 %v2764_v34, %v127_v28 }
  0x97   :  { %v129_v31 = vpop.f32.mrf.mxu1 }
  0x98   :  { %v130_v58 = vadd.f32 %v2764_v34, %v129_v31 }
  0x99   :  { %v2786_v46 = vpop.f32.mrf.mxu2 }
  0x9a   :  { %v138_v54 = vadd.f32 %v2764_v34, %v2786_v46  ;;  %v2371_v46 = vld [vmem:[%s2984_s2 + $0x28] sm:$0xff] }
  0x9f   :  { %v2757_v32 = vpop.f32.mrf.mxu1 }
  0xa0   :  { %v133_v9 = vadd.f32 %v2764_v34, %v2757_v32  ;;  %v2365_v32 = vld [vmem:[%s2984_s2 + $0x38] sm:$0xff] }
  0xa1   :  { %v2794_v49 = vpop.f32.mrf.mxu2  ;;  %639 = vmatpush.bf16.msrb.mxu3 %v2365_v32 }
  0xa2   :  { %v140_v13 = vadd.f32 %v2764_v34, %v2794_v49  ;;  %v2377_v49 = vld [vmem:[%s2984_s2 + $0x18] sm:$0xff] }
  0xa7   :  { %v2759_v33 = vpop.f32.mrf.mxu1 }
  0xa8   :  { %v135_v26 = vadd.f32 %v2764_v34, %v2759_v33  ;;  %v2363_v33 = vld [vmem:[%s2984_s2 + $0x28] sm:$0xff] }
  0xa9   :  { %v2802_v52 = vpop.f32.mrf.mxu2 }
  0xaf   :  { %v229_v36 = vpop.f32.mrf.mxu1 }
  0xb0   :  { %v233_v37 = vadd.f32 %v229_v36, %v128_v35  ;;  %v2364_v35 = vld [vmem:[%s2984_s2 + $0x30] sm:$0xff]  ;;  %v2362_v36 = vld [vmem:[%s2984_s2 + $0x20] sm:$0xff] }
  0xb1   :  { %v2813_v56 = vpop.f32.mrf.mxu2  ;;  %640 = vmatpush.bf16.msrb.mxu3 %v2364_v35 }
  0xb2   :  { %2475 = vtanh.f32 %v233_v37 }
  0xb5   :  { %641 = vmatpush.bf16.msrb.mxu3 %v2363_v33 }
  0xb7   :  { %v231_v38 = vpop.f32.mrf.mxu1 }
  0xb8   :  { %v2767_v39 = vpop.eup %2475  ;;  %v2361_v38 = vld [vmem:[%s2984_s2 + $0x18] sm:$0xff] }
  0xb9   :  { %v238_v40 = vpack.c.bf16 %v2767_v39, %v2767_v39  ;;  %642 = vmatpush.bf16.msrb.mxu3 %v2362_v36  ;;  %v2412_v36 = vld [vmem:[#allocation7 + $0x30] sm:$0xff] }
  0xbb   :  { %311 = vmatmul.bf16.vlgmr.msrb.gmra.mxu2 %v238_v40  ;;  %v2360_v40 = vld [vmem:[%s2984_s2 + $0x10] sm:$0xff] }
  0xbc   :  { %904 = vmatpush.bf16.msrb.mxu2 %v2389_v14 }
  0xbd   :  { %643 = vmatpush.bf16.msrb.mxu3 %v2361_v38  ;;  %v2410_v38 = vld [vmem:[#allocation7 + $0x20] sm:$0xff] }
  0xc0   :  { %905 = vmatpush.bf16.msrb.mxu2 %v2388_v19 }
  0xc1   :  { %644 = vmatpush.bf16.msrb.mxu3 %v2360_v40  ;;  %v2409_v40 = vld [vmem:[#allocation7 + $0x18] sm:$0xff] }
  0xc4   :  { %906 = vmatpush.bf16.msrb.mxu2 %v2387_v20 }
  0xc5   :  { %645 = vmatpush.bf16.msrb.mxu3 %v2359_v41  ;;  %v2408_v41 = vld [vmem:[#allocation7 + $0x10] sm:$0xff] }
  0xc8   :  { %907 = vmatpush.bf16.msrb.mxu2 %v2386_v21 }
  0xcc   :  { %908 = vmatpush.bf16.msrb.mxu2 %v2385_v22 }
  0xd0   :  { %909 = vmatpush.bf16.msrb.mxu2 %v2384_v23  ;;  %v2933_v23 = vld [vmem:[%s2988_s6] ss:$0 sm:$0xff] }
  0xd4   :  { %910 = vmatpush.bf16.msrb.mxu2 %v2383_v24 }
  0xd8   :  { %911 = vmatpush.bf16.msrb.mxu2 %v2382_v25  ;;  %v2376_v25 = vld [vmem:[%s2984_s2 + $0x10] sm:$0xff] }
 0x13e   :  { %v312_v59 = vpop.f32.mrf.mxu2 }
 0x13f   :  { %v316_v60 = vadd.f32 %v312_v59, %v130_v58 }
 0x141   :  { %2477 = vtanh.f32 %v316_v60  ;;  %v2373_v60 = vld [vmem:[%s2984_s2 + $0x38] sm:$0xff] }
 0x142   :  { %723 = vmatpush.bf16.msra.mxu0 %v2373_v60 }
 0x146   :  { %v314_v61 = vpop.f32.mrf.mxu2 }
 0x147   :  { %v2819_v62 = vpop.eup %2477 }
 0x148   :  { %v322_v63 = vpack.c.bf16 %v2819_v62, %v2819_v62  ;;  %v832_v37 = vpack.c.bf16 %v2819_v62, %v2767_v39  ;;  %v2358_v39 = vld [vmem:[%s2984_s2] sm:$0xff]  ;;  %v2372_v62 = vld [vmem:[%s2984_s2 + $0x30] sm:$0xff] }
 0x149   :  { %646 = vmatpush.bf16.msrb.mxu3 %v2358_v39  ;;  %724 = vmatpush.bf16.msra.mxu0 %v2372_v62  ;;  %v2407_v39 = vld [vmem:[#allocation7 + $0x8] sm:$0xff]  ;;  %v2418_v62 = vld [vmem:[#allocation7 + $0x20] sm:$0xff] }
 0x14a   :  { %395 = vmatmul.bf16.vlgmr.msra.gmra.mxu3 %v322_v63  ;;  %v2370_v63 = vld [vmem:[%s2984_s2 + $0x20] sm:$0xff] }
 0x14d   :  { %1006 = vmatpush.bf16.msra.mxu3 %v2397_v42  ;;  %725 = vmatpush.bf16.msra.mxu0 %v2371_v46  ;;  %v2406_v42 = vld [vmem:[#allocation7] sm:$0xff]  ;;  %v2417_v46 = vld [vmem:[#allocation7 + $0x18] sm:$0xff] }
 0x151   :  { %1007 = vmatpush.bf16.msra.mxu3 %v2396_v44  ;;  %726 = vmatpush.bf16.msra.mxu0 %v2370_v63  ;;  %v143_v44 = vadd.f32 %v2764_v34, %v2802_v52  ;;  %v2420_v52 = vld [vmem:[#allocation7 + $0x30] sm:$0xff] }
 0x152   :  { %v2416_v63 = vld [vmem:[#allocation7 + $0x10] sm:$0xff] }
 0x155   :  { %1008 = vmatpush.bf16.msra.mxu3 %v2395_v45  ;;  %727 = vmatpush.bf16.msra.mxu0 %v2369_v0  ;;  %v2415_v0 = vld [vmem:[#allocation7 + $0x8] sm:$0xff] }
 0x159   :  { %1009 = vmatpush.bf16.msra.mxu3 %v2394_v47  ;;  %728 = vmatpush.bf16.msra.mxu0 %v2368_v1  ;;  %v2414_v1 = vld [vmem:[#allocation7] sm:$0xff] }
 0x15d   :  { %1010 = vmatpush.bf16.msra.mxu3 %v2393_v48  ;;  %729 = vmatpush.bf16.msra.mxu0 %v2367_v2  ;;  %v2429_v2 = vld [vmem:[#allocation7 + $0x38] sm:$0xff] }
 0x161   :  { %1011 = vmatpush.bf16.msra.mxu3 %v2392_v50  ;;  %730 = vmatpush.bf16.msra.mxu0 %v2366_v3  ;;  %v2428_v3 = vld [vmem:[#allocation7 + $0x30] sm:$0xff] }
 0x165   :  { %1012 = vmatpush.bf16.msra.mxu3 %v2391_v51  ;;  %1088 = vmatpush.bf16.msrb.mxu0 %v2405_v4  ;;  %v145_v4 = vadd.f32 %v2764_v34, %v2813_v56 }
 0x169   :  { %1013 = vmatpush.bf16.msra.mxu3 %v2390_v53  ;;  %1089 = vmatpush.bf16.msrb.mxu0 %v2404_v5 }
 0x16d   :  { %1090 = vmatpush.bf16.msrb.mxu0 %v2403_v6 }
 0x171   :  { %1091 = vmatpush.bf16.msrb.mxu0 %v2402_v7  ;;  %v2427_v7 = vld [vmem:[#allocation7 + $0x28] sm:$0xff] }
 0x1cd   :  { %v396_v10 = vpop.f32.mrf.mxu3 }
 0x1ce   :  { %v400_v11 = vadd.f32 %v396_v10, %v133_v9  ;;  %v2399_v9 = vld [vmem:[#allocation7 + $0x8] sm:$0xff]  ;;  %v2398_v10 = vld [vmem:[#allocation7] sm:$0xff] }
 0x1d0   :  { %2479 = vtanh.f32 %v400_v11  ;;  %v2381_v11 = vld [vmem:[%s2984_s2 + $0x38] sm:$0xff] }
 0x1d1   :  { %807 = vmatpush.bf16.msrb.mxu1 %v2381_v11 }
 0x1d5   :  { %v398_v16 = vpop.f32.mrf.mxu3  ;;  %808 = vmatpush.bf16.msrb.mxu1 %v2380_v12 }
 0x1d6   :  { %v2480_v17 = vpop.eup %2479 }
 0x1d7   :  { %v406_v18 = vpack.c.bf16 %v2480_v17, %v2480_v17 }
 0x1d9   :  { %479 = vmatmul.bf16.vlgmr.msra.gmra.mxu1 %v406_v18  ;;  %v2378_v18 = vld [vmem:[%s2984_s2 + $0x20] sm:$0xff] }
 0x256   :  { %v480_v27 = vpop.f32.mrf.mxu1 }
 0x257   :  { %v484_v28 = vadd.f32 %v480_v27, %v135_v26 }
 0x259   :  { %2481 = vtanh.f32 %v484_v28 }
 0x25e   :  { %v482_v29 = vpop.f32.mrf.mxu1 }
 0x25f   :  { %v2482_v30 = vpop.eup %2481  ;;  %v2375_v29 = vld [vmem:[%s2984_s2 + $0x8] sm:$0xff] }
 0x260   :  { %v490_v31 = vpack.c.bf16 %v2482_v30, %v2482_v30  ;;  %v833_v43 = vpack.c.bf16 %v2482_v30, %v2480_v17  ;;  %v2379_v17 = vld [vmem:[%s2984_s2 + $0x28] sm:$0xff]  ;;  %v2374_v30 = vld [vmem:[%s2984_s2] sm:$0xff] }
 0x261   :  { %809 = vmatpush.bf16.msrb.mxu1 %v2379_v17  ;;  %v2425_v17 = vld [vmem:[#allocation7 + $0x18] sm:$0xff] }
 0x262   :  { %563 = vmatmul.bf16.vlgmr.msra.gmra.mxu2 %v490_v31  ;;  %v2413_v31 = vld [vmem:[#allocation7 + $0x38] sm:$0xff] }
 0x265   :  { %810 = vmatpush.bf16.msrb.mxu1 %v2378_v18  ;;  %v2424_v18 = vld [vmem:[#allocation7 + $0x10] sm:$0xff] }
 0x269   :  { %811 = vmatpush.bf16.msrb.mxu1 %v2377_v49  ;;  %v2459_v49 = vld [vmem:[#allocation9 + $0x28] sm:$0xff] }
 0x26d   :  { %812 = vmatpush.bf16.msrb.mxu1 %v2376_v25  ;;  %v2457_v25 = vld [vmem:[#allocation9 + $0x18] sm:$0xff] }
 0x271   :  { %813 = vmatpush.bf16.msrb.mxu1 %v2375_v29 }
 0x272   :  { %912 = vmatmul.bf16.vlgmr.msrb.gmra.mxu2 %v832_v37  ;;  %v2411_v37 = vld [vmem:[#allocation7 + $0x28] sm:$0xff] }
 0x275   :  { %814 = vmatpush.bf16.msrb.mxu1 %v2374_v30 }
 0x279   :  { %1170 = vmatpush.bf16.msra.mxu1 %v2413_v31 }
 0x27d   :  { %1171 = vmatpush.bf16.msra.mxu1 %v2412_v36 }
 0x281   :  { %1172 = vmatpush.bf16.msra.mxu1 %v2411_v37 }
 0x282   :  { %917 = vmatmul.bf16.gmra.mxu2 %v833_v43  ;;  %v2421_v43 = vld [vmem:[#allocation7 + $0x38] sm:$0xff] }
 0x285   :  { %1173 = vmatpush.bf16.msra.mxu1 %v2410_v38  ;;  %v2437_v38 = vld [vmem:[#allocation7 + $0x38] sm:$0xff] }
 0x289   :  { %1174 = vmatpush.bf16.msra.mxu1 %v2409_v40  ;;  %v2436_v40 = vld [vmem:[#allocation7 + $0x30] sm:$0xff] }
 0x28d   :  { %1175 = vmatpush.bf16.msra.mxu1 %v2408_v41  ;;  %v2435_v41 = vld [vmem:[#allocation7 + $0x28] sm:$0xff] }
 0x291   :  { %1176 = vmatpush.bf16.msra.mxu1 %v2407_v39  ;;  %v2434_v39 = vld [vmem:[#allocation7 + $0x20] sm:$0xff] }
 0x295   :  { %1177 = vmatpush.bf16.msra.mxu1 %v2406_v42 }
 0x2e5   :  { %v564_v55 = vpop.f32.mrf.mxu2 }
 0x2e6   :  { %v568_v57 = vadd.f32 %v564_v55, %v138_v54 }
 0x2e8   :  { %2483 = vtanh.f32 %v568_v57 }
 0x2ed   :  { %v566_v58 = vpop.f32.mrf.mxu2 }
 0x2ee   :  { %v2484_v59 = vpop.eup %2483 }
 0x2ef   :  { %v574_v61 = vpack.c.bf16 %v2484_v59, %v2484_v59 }
 0x2f1   :  { %647 = vmatmul.bf16.vlgmr.msrb.gmra.mxu3 %v574_v61  ;;  %v2419_v61 = vld [vmem:[#allocation7 + $0x28] sm:$0xff] }
 0x2f2   :  { %1252 = vmatpush.bf16.msrb.mxu3 %v2421_v43  ;;  %v2433_v43 = vld [vmem:[#allocation7 + $0x18] sm:$0xff] }
 0x2f5   :  { %v913_v24 = vpop.f32.mrf.mxu2 }
 0x2f6   :  { %v914_v26 = vadd.f32 %v2933_v23, %v913_v24  ;;  %1253 = vmatpush.bf16.msrb.mxu3 %v2420_v52  ;;  %v2458_v24 = vld [vmem:[#allocation9 + $0x20] sm:$0xff] }
 0x2fa   :  { %1254 = vmatpush.bf16.msrb.mxu3 %v2419_v61 }
 0x2fd   :  { %v915_v53 = vpop.f32.mrf.mxu2 }
 0x2fe   :  { %v916_v54 = vadd.f32 %v2933_v23, %v915_v53  ;;  %1255 = vmatpush.bf16.msrb.mxu3 %v2418_v62  ;;  %v2443_v62 = vld [vmem:[#allocation7 + $0x28] sm:$0xff] }
 0x301   :  { %1014 = vmatmul.bf16.vlgmr.msra.gmra.mxu3 %v2614_v15  ;;  %v2401_v15 = vld [vmem:[#allocation7 + $0x18] sm:$0xff] }
 0x302   :  { %1092 = vmatpush.bf16.msrb.mxu0 %v2401_v15  ;;  %1256 = vmatpush.bf16.msrb.mxu3 %v2417_v46  ;;  %v2426_v15 = vld [vmem:[#allocation7 + $0x20] sm:$0xff] }
 0x303   :  { %v2442_v46 = vld [vmem:[#allocation7 + $0x20] sm:$0xff] }
 0x305   :  { %v918_v11 = vpop.f32.mrf.mxu2 }
 0x306   :  { %1093 = vmatpush.bf16.msrb.mxu0 %v2400_v8  ;;  %1257 = vmatpush.bf16.msrb.mxu3 %v2416_v63  ;;  %v919_v12 = vadd.f32 %v2933_v23, %v918_v11  ;;  %v2450_v11 = vld [vmem:[#allocation7 + $0x20] sm:$0xff] }
 0x30a   :  { %1094 = vmatpush.bf16.msrb.mxu0 %v2399_v9  ;;  %1258 = vmatpush.bf16.msrb.mxu3 %v2415_v0 }
 0x30d   :  { %v920_v29 = vpop.f32.mrf.mxu2 }
 0x30e   :  { %1095 = vmatpush.bf16.msrb.mxu0 %v2398_v10  ;;  %1259 = vmatpush.bf16.msrb.mxu3 %v2414_v1  ;;  %v921_v30 = vadd.f32 %v2933_v23, %v920_v29  ;;  %v2441_v1 = vld [vmem:[#allocation7 + $0x18] sm:$0xff] }
 0x374   :  { %v648_v14 = vpop.f32.mrf.mxu3 }
 0x375   :  { %v652_v16 = vadd.f32 %v648_v14, %v140_v13 }
 0x377   :  { %2485 = vtanh.f32 %v652_v16 }
 0x37c   :  { %v650_v19 = vpop.f32.mrf.mxu3 }
 0x37d   :  { %v2486_v20 = vpop.eup %2485  ;;  %v2423_v19 = vld [vmem:[#allocation7 + $0x8] sm:$0xff] }
 0x37e   :  { %v658_v21 = vpack.c.bf16 %v2486_v20, %v2486_v20  ;;  %v834_v22 = vpack.c.bf16 %v2486_v20, %v2484_v59  ;;  %v2422_v20 = vld [vmem:[#allocation7] sm:$0xff] }
 0x380   :  { %731 = vmatmul.bf16.vlgmr.msra.gmra.mxu0 %v658_v21  ;;  %922 = vmatmul.bf16.gmra.mxu2 %v834_v22  ;;  %v2461_v21 = vld [vmem:[#allocation9 + $0x38] sm:$0xff]  ;;  %v2460_v22 = vld [vmem:[#allocation9 + $0x30] sm:$0xff] }
 0x381   :  { %1334 = vmatpush.bf16.msra.mxu0 %v2429_v2  ;;  %v2440_v2 = vld [vmem:[#allocation7 + $0x10] sm:$0xff] }
 0x384   :  { %v1015_v27 = vpop.f32.mrf.mxu3 }
 0x385   :  { %v1019_v28 = vadd.f32 %v1015_v27, %v914_v26  ;;  %1335 = vmatpush.bf16.msra.mxu0 %v2428_v3  ;;  %v2456_v26 = vld [vmem:[#allocation9 + $0x10] sm:$0xff]  ;;  %v2455_v27 = vld [vmem:[#allocation9 + $0x8] sm:$0xff] }
 0x387   :  { %2487 = vtanh.f32 %v1019_v28  ;;  %v2454_v28 = vld [vmem:[#allocation9] sm:$0xff] }
 0x389   :  { %1336 = vmatpush.bf16.msra.mxu0 %v2427_v7 }
 0x38c   :  { %v1017_v32 = vpop.f32.mrf.mxu3 }
 0x38d   :  { %v2945_v35 = vpop.eup %2487  ;;  %1337 = vmatpush.bf16.msra.mxu0 %v2426_v15  ;;  %v2438_v15 = vld [vmem:[#allocation7] sm:$0xff] }
 0x38e   :  { %v1023_v33 = vpack.c.bf16 %v2945_v35, %v2945_v35 }
 0x390   :  { %1096 = vmatmul.bf16.vlgmr.msrb.gmra.mxu0 %v1023_v33 }
 0x391   :  { %1338 = vmatpush.bf16.msra.mxu0 %v2425_v17 }
 0x395   :  { %1339 = vmatpush.bf16.msra.mxu0 %v2424_v18 }
 0x399   :  { %1340 = vmatpush.bf16.msra.mxu0 %v2423_v19  ;;  %v2449_v19 = vld [vmem:[#allocation7 + $0x18] sm:$0xff] }
 0x39d   :  { %1341 = vmatpush.bf16.msra.mxu0 %v2422_v20  ;;  %v2448_v20 = vld [vmem:[#allocation7 + $0x10] sm:$0xff] }
 0x3a1   :  { %1676 = vmatpush.bf16.msrb.mxu0 %v2461_v21  ;;  %v2447_v21 = vld [vmem:[#allocation7 + $0x8] sm:$0xff] }
 0x3a5   :  { %1677 = vmatpush.bf16.msrb.mxu0 %v2460_v22  ;;  %v2446_v22 = vld [vmem:[#allocation7] sm:$0xff] }
 0x3a9   :  { %1678 = vmatpush.bf16.msrb.mxu0 %v2459_v49 }
 0x3ad   :  { %1679 = vmatpush.bf16.msrb.mxu0 %v2458_v24 }
 0x3b1   :  { %1680 = vmatpush.bf16.msrb.mxu0 %v2457_v25 }
 0x3b5   :  { %1681 = vmatpush.bf16.msrb.mxu0 %v2456_v26 }
 0x3b9   :  { %1682 = vmatpush.bf16.msrb.mxu0 %v2455_v27 }
 0x3bd   :  { %1683 = vmatpush.bf16.msrb.mxu0 %v2454_v28 }
 0x3fd   :  { %v732_v45 = vpop.f32.mrf.mxu0 }
 0x3fe   :  { %v736_v47 = vadd.f32 %v732_v45, %v143_v44  ;;  %v2432_v45 = vld [vmem:[#allocation7 + $0x10] sm:$0xff] }
 0x400   :  { %2489 = vtanh.f32 %v736_v47  ;;  %v2431_v47 = vld [vmem:[#allocation7 + $0x8] sm:$0xff] }
 0x405   :  { %v734_v48 = vpop.f32.mrf.mxu0 }
 0x406   :  { %v2490_v50 = vpop.eup %2489  ;;  %v2430_v48 = vld [vmem:[#allocation7] sm:$0xff] }
 0x407   :  { %v742_v51 = vpack.c.bf16 %v2490_v50, %v2490_v50 }
 0x409   :  { %815 = vmatmul.bf16.vlgmr.msrb.gmra.mxu1 %v742_v51 }
 0x40a   :  { %1416 = vmatpush.bf16.msrb.mxu1 %v2437_v38 }
 0x40d   :  { %v1097_v55 = vpop.f32.mrf.mxu0 }
 0x40e   :  { %v1101_v57 = vadd.f32 %v1097_v55, %v916_v54  ;;  %1417 = vmatpush.bf16.msrb.mxu1 %v2436_v40 }
 0x410   :  { %2491 = vtanh.f32 %v1101_v57 }
 0x412   :  { %1418 = vmatpush.bf16.msrb.mxu1 %v2435_v41 }
 0x415   :  { %v1099_v58 = vpop.f32.mrf.mxu0 }
 0x416   :  { %v2952_v59 = vpop.eup %2491  ;;  %1419 = vmatpush.bf16.msrb.mxu1 %v2434_v39  ;;  %v2445_v58 = vld [vmem:[#allocation7 + $0x38] sm:$0xff] }
 0x417   :  { %v1105_v60 = vpack.c.bf16 %v2952_v59, %v2952_v59  ;;  %v1604_v42 = vpack.c.bf16 %v2952_v59, %v2945_v35  ;;  %v2966_v59 = vld [vmem:[%s2990_s8] ss:$0 sm:$0xff]  ;;  %1498 = vmatpush.bf16.msra.mxu2 %v2445_v58  ;;  %s2615_s8 = smov [#allocation10]  }
 0x418   :  { %s1717_s18 = sshll.u32 %s2615_s8, 4  ;;  %s1718_s18 = int_to_ptr.vmem [resolvable:$true] %s1717_s18 }
 0x419   :  { %1178 = vmatmul.bf16.vlgmr.msra.gmra.mxu1 %v1105_v60  ;;  %v2444_v60 = vld [vmem:[#allocation7 + $0x30] sm:$0xff] }
 0x41a   :  { %1420 = vmatpush.bf16.msrb.mxu1 %v2433_v43 }
 0x41b   :  { %1499 = vmatpush.bf16.msra.mxu2 %v2444_v60 }
 0x41e   :  { %1421 = vmatpush.bf16.msrb.mxu1 %v2432_v45 }
 0x41f   :  { %1500 = vmatpush.bf16.msra.mxu2 %v2443_v62 }
 0x422   :  { %1422 = vmatpush.bf16.msrb.mxu1 %v2431_v47 }
 0x423   :  { %1501 = vmatpush.bf16.msra.mxu2 %v2442_v46 }
 0x426   :  { %1423 = vmatpush.bf16.msrb.mxu1 %v2430_v48 }
 0x427   :  { %1502 = vmatpush.bf16.msra.mxu2 %v2441_v1 }
 0x42b   :  { %1503 = vmatpush.bf16.msra.mxu2 %v2440_v2 }
 0x486   :  { %v816_v5 = vpop.f32.mrf.mxu1 }
 0x487   :  { %v820_v6 = vadd.f32 %v816_v5, %v145_v4  ;;  %v2439_v5 = vld [vmem:[#allocation7 + $0x8] sm:$0xff] }
 0x488   :  { %1504 = vmatpush.bf16.msra.mxu2 %v2439_v5 }
 0x489   :  { %2493 = vtanh.f32 %v820_v6 }
 0x48c   :  { %1505 = vmatpush.bf16.msra.mxu2 %v2438_v15 }
 0x48e   :  { %v818_v8 = vpop.f32.mrf.mxu1 }
 0x48f   :  { %v2494_v9 = vpop.eup %2493  ;;  %v2453_v8 = vld [vmem:[#allocation7 + $0x38] sm:$0xff] }
 0x490   :  { %v835_v10 = vpack.c.bf16 %v2494_v9, %v2490_v50  ;;  %v923_v50 = vpop.f32.mrf.mxu2  ;;  %1580 = vmatpush.bf16.msra.mxu3 %v2453_v8  ;;  %v2452_v9 = vld [vmem:[#allocation7 + $0x30] sm:$0xff] }
 0x491   :  { %v924_v51 = vadd.f32 %v2933_v23, %v923_v50 }
 0x492   :  { %927 = vmatmul.bf16.gmra.mxu2 %v835_v10  ;;  %v2451_v10 = vld [vmem:[#allocation7 + $0x28] sm:$0xff] }
 0x494   :  { %1581 = vmatpush.bf16.msra.mxu3 %v2452_v9 }
 0x496   :  { %v1179_v13 = vpop.f32.mrf.mxu1 }
 0x497   :  { %v1183_v14 = vadd.f32 %v1179_v13, %v919_v12 }
 0x498   :  { %1582 = vmatpush.bf16.msra.mxu3 %v2451_v10  ;;  %v925_v12 = vpop.f32.mrf.mxu2 }
 0x499   :  { %2495 = vtanh.f32 %v1183_v14  ;;  %v926_v13 = vadd.f32 %v2933_v23, %v925_v12 }
 0x49c   :  { %1583 = vmatpush.bf16.msra.mxu3 %v2450_v11 }
 0x49e   :  { %v1181_v16 = vpop.f32.mrf.mxu1 }
 0x49f   :  { %v2496_v34 = vpop.eup %2495 }
 0x4a0   :  { %v1187_v56 = vpack.c.bf16 %v2496_v34, %v2496_v34  ;;  %1584 = vmatpush.bf16.msra.mxu3 %v2449_v19 }
 0x4a2   :  { %1260 = vmatmul.bf16.vlgmr.msrb.gmra.mxu3 %v1187_v56 }
 0x4a4   :  { %1585 = vmatpush.bf16.msra.mxu3 %v2448_v20 }
 0x4a8   :  { %1586 = vmatpush.bf16.msra.mxu3 %v2447_v21 }
 0x4ac   :  { %1587 = vmatpush.bf16.msra.mxu3 %v2446_v22 }
 0x515   :  { %v928_v49 = vpop.f32.mrf.mxu2 }
 0x516   :  { %v929_v27 = vadd.f32 %v2933_v23, %v928_v49 }
 0x51d   :  { %v930_v24 = vpop.f32.mrf.mxu2 }
 0x525   :  { %v1261_v31 = vpop.f32.mrf.mxu3 }
 0x526   :  { %v1265_v32 = vadd.f32 %v1261_v31, %v921_v30 }
 0x528   :  { %2497 = vtanh.f32 %v1265_v32 }
 0x52d   :  { %v1263_v33 = vpop.f32.mrf.mxu3 }
 0x52e   :  { %v2498_v36 = vpop.eup %2497 }
 0x52f   :  { %v1269_v37 = vpack.c.bf16 %v2498_v36, %v2498_v36  ;;  %v1605_v44 = vpack.c.bf16 %v2498_v36, %v2496_v34 }
 0x531   :  { %1342 = vmatmul.bf16.vlgmr.msra.gmra.mxu0 %v1269_v37  ;;  %v931_v37 = vadd.f32 %v2933_v23, %v930_v24 }
 0x541   :  { %1684 = vmatmul.bf16.vlgmr.msrb.gmra.mxu0 %v1604_v42 }
 0x551   :  { %1689 = vmatmul.bf16.gmra.mxu0 %v1605_v44 }
 0x5ae   :  { %v1343_v53 = vpop.f32.mrf.mxu0 }
 0x5af   :  { %v1347_v54 = vadd.f32 %v1343_v53, %v924_v51 }
 0x5b1   :  { %2499 = vtanh.f32 %v1347_v54 }
 0x5b6   :  { %v1345_v55 = vpop.f32.mrf.mxu0 }
 0x5b7   :  { %v2500_v35 = vpop.eup %2499 }
 0x5b8   :  { %v1351_v57 = vpack.c.bf16 %v2500_v35, %v2500_v35 }
 0x5ba   :  { %1424 = vmatmul.bf16.vlgmr.msrb.gmra.mxu1 %v1351_v57 }
 0x5be   :  { %v1685_v52 = vpop.f32.mrf.mxu0 }
 0x5bf   :  { %v1686_v61 = vadd.f32 %v2966_v59, %v1685_v52 }
 0x5c1   :  { %1705 = vst [vmem:[#allocation10] sm:$0xff] %v1686_v61 }
 0x5c6   :  { %v1687_v63 = vpop.f32.mrf.mxu0 }
 0x5c7   :  { %v1688_v0 = vadd.f32 %v2966_v59, %v1687_v63 }
 0x5c9   :  { %1706 = vst [vmem:[#allocation10 + $0x8] sm:$0xff] %v1688_v0 }
 0x5ce   :  { %v1690_v3 = vpop.f32.mrf.mxu0 }
 0x5cf   :  { %v1691_v4 = vadd.f32 %v2966_v59, %v1690_v3 }
 0x5d1   :  { %1707 = vst [vmem:[#allocation10 + $0x10] sm:$0xff] %v1691_v4 }
 0x5d6   :  { %v1692_v6 = vpop.f32.mrf.mxu0 }
 0x5d7   :  { %v1693_v7 = vadd.f32 %v2966_v59, %v1692_v6 }
 0x5d9   :  { %1708 = vst [vmem:[#allocation10 + $0x18] sm:$0xff] %v1693_v7 }
 0x637   :  { %v1425_v14 = vpop.f32.mrf.mxu1 }
 0x638   :  { %v1429_v16 = vadd.f32 %v1425_v14, %v926_v13 }
 0x63a   :  { %2501 = vtanh.f32 %v1429_v16 }
 0x63f   :  { %v1427_v34 = vpop.f32.mrf.mxu1 }
 0x640   :  { %v2502_v56 = vpop.eup %2501 }
 0x641   :  { %v1433_v17 = vpack.c.bf16 %v2502_v56, %v2502_v56  ;;  %v1606_v18 = vpack.c.bf16 %v2502_v56, %v2500_v35 }
 0x643   :  { %1506 = vmatmul.bf16.vlgmr.msra.gmra.mxu2 %v1433_v17  ;;  %1694 = vmatmul.bf16.gmra.mxu0 %v1606_v18 }
 0x6c0   :  { %v1695_v25 = vpop.f32.mrf.mxu0 }
 0x6c1   :  { %v1696_v26 = vadd.f32 %v2966_v59, %v1695_v25 }
 0x6c3   :  { %1709 = vst [vmem:[#allocation10 + $0x20] sm:$0xff] %v1696_v26 }
 0x6c6   :  { %v1507_v28 = vpop.f32.mrf.mxu2 }
 0x6c7   :  { %v1511_v29 = vadd.f32 %v1507_v28, %v929_v27 }
 0x6c8   :  { %v1697_v30 = vpop.f32.mrf.mxu0 }
 0x6c9   :  { %2503 = vtanh.f32 %v1511_v29  ;;  %v1698_v31 = vadd.f32 %v2966_v59, %v1697_v30 }
 0x6cb   :  { %1710 = vst [vmem:[#allocation10 + $0x28] sm:$0xff] %v1698_v31 }
 0x6ce   :  { %v1509_v32 = vpop.f32.mrf.mxu2 }
 0x6cf   :  { %v2504_v33 = vpop.eup %2503 }
 0x6d0   :  { %v1515_v36 = vpack.c.bf16 %v2504_v33, %v2504_v33 }
 0x6d2   :  { %1588 = vmatmul.bf16.vlgmr.msra.gmra.mxu3 %v1515_v36 }
 0x755   :  { %v1589_v38 = vpop.f32.mrf.mxu3 }
 0x756   :  { %v1593_v40 = vadd.f32 %v1589_v38, %v931_v37 }
 0x758   :  { %2505 = vtanh.f32 %v1593_v40 }
 0x75d   :  { %v1591_v41 = vpop.f32.mrf.mxu3 }
 0x75e   :  { %v2506_v39 = vpop.eup %2505 }
 0x75f   :  { %v1607_v42 = vpack.c.bf16 %v2506_v39, %v2504_v33 }
 0x761   :  { %1699 = vmatmul.bf16.gmra.mxu0 %v1607_v42 }
 0x7de   :  { %v1700_v43 = vpop.f32.mrf.mxu0 }
 0x7df   :  { %v1701_v44 = vadd.f32 %v2966_v59, %v1700_v43 }
 0x7e1   :  { %1711 = vst [vmem:[#allocation10 + $0x30] sm:$0xff] %v1701_v44 }
 0x7e6   :  { %v1702_v45 = vpop.f32.mrf.mxu0 }
 0x7e7   :  { %v1703_v23 = vadd.f32 %v2966_v59, %v1702_v45 }
 0x7e9   :  { %1712 = vst [vmem:[#allocation10 + $0x38] sm:$0xff] %v1703_v23 }
 0x7ea   :  { %1725 = dma.vmem_to_hbm [thread:$0]  %s1718_s18, 1024, %s1720_s0, [#allocation6], %s2616_s21, %s2616_s21, %s2617_s22  }
 0x7eb   :  { %2607 = dma.done.wait [#allocation6], 1024  }
 0x7ec   :  { %2608 = vsyncadd [#allocation6], 4294966272 }
 0x7ed   :  { %1730 = vsyncpa [#allocation5], 1 }
 0x7ee   :  { %1731 = vsyncpa [#allocation8], 1 }
 0x7ef   :  { %1732 = vsyncpa [#allocation6], 1 }

</bundles_post_ra>
